<compile_context>
chip_gen: v6e
topology: v6e:2x2x1
jax: 0.10.0
libtpu: 0.0.40
codegen_flags: <defaults>
</compile_context>

<pallas_src>
import jax
import jax.numpy as jnp
from jax import lax
from jax.experimental import pallas as pl
from jax.experimental.pallas import tpu as pltpu


def pam_kernel(gamma_ref, wq_ref, bq_ref, wk_ref, bk_ref, wv_ref, bv_ref,
               x_ref, o_ref):
    # x_ref view: (C, N)  -- batch dim squeezed out by the BlockSpec.
    x = x_ref[...]
    in_dtype = x.dtype

    # 1x1 convs == channel matmuls over the flattened spatial axis.
    # q, k: (Cq, N); v: (C, N). f32 accumulation on the MXU, bias broadcast.
    q = lax.dot_general(wq_ref[...], x, (((1,), (0,)), ((), ())),
                        preferred_element_type=jnp.float32) + bq_ref[...]
    k = lax.dot_general(wk_ref[...], x, (((1,), (0,)), ((), ())),
                        preferred_element_type=jnp.float32) + bk_ref[...]
    v = lax.dot_general(wv_ref[...], x, (((1,), (0,)), ((), ())),
                        preferred_element_type=jnp.float32) + bv_ref[...]

    # energy[i, j] = sum_c q[c, i] * k[c, j]  -> (N, N)
    # TN-form dot_general: contract the shared leading channel dim, no q^T.
    energy = lax.dot_general(q.astype(in_dtype), k.astype(in_dtype),
                             (((0,), (0,)), ((), ())),
                             preferred_element_type=jnp.float32)

    # Numerically-stable softmax over the last dim (f32 VPU/EUP math,
    # single row-max reduction, approx reciprocal on the EUP slot).
    m = jnp.max(energy, axis=-1, keepdims=True)
    p = jnp.exp(energy - m)
    attention = p * pl.reciprocal(jnp.sum(p, axis=-1, keepdims=True),
                                  approx=True)

    # out[c, i] = sum_j v[c, j] * attention[i, j]  -> (C, N)
    # NT-form dot_general: contract both last dims, no attention^T copy.
    out = lax.dot_general(v.astype(in_dtype), attention.astype(in_dtype),
                          (((1,), (1,)), ((), ())),
                          preferred_element_type=jnp.float32)

    gamma = gamma_ref[0]
    o_ref[...] = (gamma * out + x.astype(jnp.float32)).astype(o_ref.dtype)


def pam_module_forward(x, wq, bq, wk, bk, wv, bv, gamma):
    """x: (B, C, H, W); wq/wk: (C//8, C); wv: (C, C); biases 1-D; gamma: (1,)."""
    B, C, H, W = x.shape
    N = H * W
    Cq = wq.shape[0]
    x_flat = x.reshape(B, C, N)

    # Biases as (c, 1) columns so they broadcast over the lane (N) axis.
    bq2 = bq.reshape(Cq, 1).astype(jnp.float32)
    bk2 = bk.reshape(Cq, 1).astype(jnp.float32)
    bv2 = bv.reshape(C, 1).astype(jnp.float32)
    gamma = gamma.reshape(1).astype(jnp.float32)

    out_flat = pl.pallas_call(
        pam_kernel,
        out_shape=jax.ShapeDtypeStruct((B, C, N), x.dtype),
        grid_spec=pltpu.PrefetchScalarGridSpec(
            num_scalar_prefetch=0,
            grid=(B,),
            in_specs=[
                pl.BlockSpec(memory_space=pltpu.MemorySpace.SMEM),      # gamma
                pl.BlockSpec((Cq, C), lambda b: (0, 0)),                # Wq
                pl.BlockSpec((Cq, 1), lambda b: (0, 0)),                # bq
                pl.BlockSpec((Cq, C), lambda b: (0, 0)),                # Wk
                pl.BlockSpec((Cq, 1), lambda b: (0, 0)),                # bk
                pl.BlockSpec((C, C), lambda b: (0, 0)),                 # Wv
                pl.BlockSpec((C, 1), lambda b: (0, 0)),                 # bv
                pl.BlockSpec((pl.Squeezed(), C, N), lambda b: (b, 0, 0)),   # x
            ],
            out_specs=pl.BlockSpec((pl.Squeezed(), C, N), lambda b: (b, 0, 0)),
        ),
        compiler_params=pltpu.CompilerParams(
            dimension_semantics=("parallel",),
        ),
    )(gamma, wq, bq2, wk, bk2, wv, bv2, x_flat)

    return out_flat.reshape(B, C, H, W)


def pam_module_reference(x, wq, bq, wk, bk, wv, bv, gamma):
    """Pure-JAX reference mirroring the PyTorch PAM_Module forward."""
    B, C, H, W = x.shape
    N = H * W
    xf = x.reshape(B, C, N)
    q = jnp.einsum("qc,bcn->bqn", wq, xf) + bq[None, :, None]   # (B, Cq, N)
    k = jnp.einsum("qc,bcn->bqn", wk, xf) + bk[None, :, None]   # (B, Cq, N)
    v = jnp.einsum("oc,bcn->bon", wv, xf) + bv[None, :, None]   # (B, C, N)
    energy = jnp.einsum("bqi,bqj->bij", q, k)                   # (B, N, N)
    attention = jax.nn.softmax(energy, axis=-1)
    out = jnp.einsum("bcj,bij->bci", v, attention)              # (B, C, N)
    return gamma * out.reshape(B, C, H, W) + x


if __name__ == "__main__":
    key = jax.random.PRNGKey(0)
    # C must be >= 8 so the query/key projection dim C // 8 >= 1 (PAM spec).
    B, C, H, W = 2, 16, 16, 16
    Cq = C // 8

    keys = jax.random.split(key, 7)
    x = jax.random.normal(keys[0], (B, C, H, W), dtype=jnp.float32)
    scale = 1.0 / jnp.sqrt(jnp.float32(C))
    wq = jax.random.normal(keys[1], (Cq, C), dtype=jnp.float32) * scale
    bq = jax.random.normal(keys[2], (Cq,), dtype=jnp.float32) * 0.1
    wk = jax.random.normal(keys[3], (Cq, C), dtype=jnp.float32) * scale
    bk = jax.random.normal(keys[4], (Cq,), dtype=jnp.float32) * 0.1
    wv = jax.random.normal(keys[5], (C, C), dtype=jnp.float32) * scale
    bv = jax.random.normal(keys[6], (C,), dtype=jnp.float32) * 0.1

    gamma_init = jnp.zeros((1,), dtype=jnp.float32)    # module __init__ state
    gamma_test = jnp.array([0.5], dtype=jnp.float32)   # exercise attention path

    out = jax.block_until_ready(
        pam_module_forward(x, wq, bq, wk, bk, wv, bv, gamma_test))
    ref = pam_module_reference(x, wq, bq, wk, bk, wv, bv, gamma_test)
    assert out.shape == (B, C, H, W)
    max_err = float(jnp.max(jnp.abs(out - ref)))
    assert jnp.allclose(out, ref, atol=5e-3, rtol=5e-3), f"mismatch: {max_err}"

    # gamma = 0 (module's initial state): out == x.
    out0 = jax.block_until_ready(
        pam_module_forward(x, wq, bq, wk, bk, wv, bv, gamma_init))
    assert jnp.allclose(out0, x, atol=1e-5, rtol=1e-5)

    print("KERNEL_OK")
</pallas_src>

<mosaic_0001>
module attributes {stable_mosaic.version = 11 : i64} {
  func.func @pam_kernel(%arg0: i32, %arg1: memref<1xf32, #tpu.memory_space<smem>>, %arg2: memref<2x16xf32, #tpu.memory_space<vmem>>, %arg3: memref<2x1xf32, #tpu.memory_space<vmem>>, %arg4: memref<2x16xf32, #tpu.memory_space<vmem>>, %arg5: memref<2x1xf32, #tpu.memory_space<vmem>>, %arg6: memref<16x16xf32, #tpu.memory_space<vmem>>, %arg7: memref<16x1xf32, #tpu.memory_space<vmem>>, %arg8: memref<1x16x256xf32, #tpu.memory_space<vmem>>, %arg9: memref<1x16x256xf32, #tpu.memory_space<vmem>>) attributes {dimension_semantics = [#tpu.dimension_semantics<parallel>], iteration_bounds = array<i64: 2>, scalar_prefetch = 0 : i64, scratch_operands = 0 : i64, tpu.core_type = #tpu.core_type<tc>, window_params = [{transform_indices = @transform_0, window_bounds = array<i64: 1>}, {pipeline_mode = #tpu.pipeline_mode<synchronous>, transform_indices = @transform_1, window_bounds = array<i64: 2, 16>}, {pipeline_mode = #tpu.pipeline_mode<synchronous>, transform_indices = @transform_2, window_bounds = array<i64: 2, 1>}, {pipeline_mode = #tpu.pipeline_mode<synchronous>, transform_indices = @transform_3, window_bounds = array<i64: 2, 16>}, {pipeline_mode = #tpu.pipeline_mode<synchronous>, transform_indices = @transform_4, window_bounds = array<i64: 2, 1>}, {pipeline_mode = #tpu.pipeline_mode<synchronous>, transform_indices = @transform_5, window_bounds = array<i64: 16, 16>}, {pipeline_mode = #tpu.pipeline_mode<synchronous>, transform_indices = @transform_6, window_bounds = array<i64: 16, 1>}, {transform_indices = @transform_7, window_bounds = array<i64: 1, 16, 256>}, {transform_indices = @transform_8, window_bounds = array<i64: 1, 16, 256>}]} {
    %c0 = arith.constant 0 : index
    %c0_0 = arith.constant 0 : index
    %c0_1 = arith.constant 0 : index
    %0 = vector.load %arg8[%c0, %c0_0, %c0_1] : memref<1x16x256xf32, #tpu.memory_space<vmem>>, vector<1x16x256xf32>
    %1 = vector.shape_cast %0 : vector<1x16x256xf32> to vector<16x256xf32>
    %c0_2 = arith.constant 0 : index
    %c0_3 = arith.constant 0 : index
    %2 = vector.load %arg2[%c0_2, %c0_3] : memref<2x16xf32, #tpu.memory_space<vmem>>, vector<2x16xf32>
    %cst = arith.constant dense<0.000000e+00> : vector<2x256xf32>
    %3 = tpu.matmul %2, %1, %cst {dimension_numbers = #tpu.dot_dimension_numbers<[1], [0], [0], [1], [0, 0, 1, 1], [], []>} : vector<2x16xf32>, vector<16x256xf32>, vector<2x256xf32> -> vector<2x256xf32>
    %c0_4 = arith.constant 0 : index
    %c0_5 = arith.constant 0 : index
    %4 = vector.load %arg3[%c0_4, %c0_5] : memref<2x1xf32, #tpu.memory_space<vmem>>, vector<2x1xf32>
    %5 = vector.broadcast %4 : vector<2x1xf32> to vector<2x256xf32>
    %6 = arith.addf %3, %5 : vector<2x256xf32>
    %c0_6 = arith.constant 0 : index
    %c0_7 = arith.constant 0 : index
    %7 = vector.load %arg4[%c0_6, %c0_7] : memref<2x16xf32, #tpu.memory_space<vmem>>, vector<2x16xf32>
    %cst_8 = arith.constant dense<0.000000e+00> : vector<2x256xf32>
    %8 = tpu.matmul %7, %1, %cst_8 {dimension_numbers = #tpu.dot_dimension_numbers<[1], [0], [0], [1], [0, 0, 1, 1], [], []>} : vector<2x16xf32>, vector<16x256xf32>, vector<2x256xf32> -> vector<2x256xf32>
    %c0_9 = arith.constant 0 : index
    %c0_10 = arith.constant 0 : index
    %9 = vector.load %arg5[%c0_9, %c0_10] : memref<2x1xf32, #tpu.memory_space<vmem>>, vector<2x1xf32>
    %10 = vector.broadcast %9 : vector<2x1xf32> to vector<2x256xf32>
    %11 = arith.addf %8, %10 : vector<2x256xf32>
    %c0_11 = arith.constant 0 : index
    %c0_12 = arith.constant 0 : index
    %12 = vector.load %arg6[%c0_11, %c0_12] : memref<16x16xf32, #tpu.memory_space<vmem>>, vector<16x16xf32>
    %cst_13 = arith.constant dense<0.000000e+00> : vector<16x256xf32>
    %13 = tpu.matmul %12, %1, %cst_13 {dimension_numbers = #tpu.dot_dimension_numbers<[1], [0], [0], [1], [0, 0, 1, 1], [], []>} : vector<16x16xf32>, vector<16x256xf32>, vector<16x256xf32> -> vector<16x256xf32>
    %c0_14 = arith.constant 0 : index
    %c0_15 = arith.constant 0 : index
    %14 = vector.load %arg7[%c0_14, %c0_15] : memref<16x1xf32, #tpu.memory_space<vmem>>, vector<16x1xf32>
    %15 = vector.broadcast %14 : vector<16x1xf32> to vector<16x256xf32>
    %16 = arith.addf %13, %15 : vector<16x256xf32>
    %cst_16 = arith.constant dense<0.000000e+00> : vector<256x256xf32>
    %17 = tpu.matmul %6, %11, %cst_16 {dimension_numbers = #tpu.dot_dimension_numbers<[0], [0], [1], [1], [0, 1, 1, 1], [], []>} : vector<2x256xf32>, vector<2x256xf32>, vector<256x256xf32> -> vector<256x256xf32>
    %cst_17 = arith.constant dense<0xFF800000> : vector<256xf32>
    %18 = vector.multi_reduction <maximumf>, %17, %cst_17 [1] : vector<256x256xf32> to vector<256xf32>
    %19 = vector.shape_cast %18 : vector<256xf32> to vector<256x1xf32>
    %20 = vector.broadcast %19 : vector<256x1xf32> to vector<256x256xf32>
    %21 = arith.subf %17, %20 : vector<256x256xf32>
    %22 = math.exp %21 : vector<256x256xf32>
    %cst_18 = arith.constant dense<0.000000e+00> : vector<256xf32>
    %23 = vector.multi_reduction <add>, %22, %cst_18 [1] : vector<256x256xf32> to vector<256xf32>
    %24 = vector.shape_cast %23 : vector<256xf32> to vector<256x1xf32>
    %25 = tpu.reciprocal %24 {approx = true} : vector<256x1xf32> -> vector<256x1xf32>
    %26 = vector.broadcast %25 : vector<256x1xf32> to vector<256x256xf32>
    %27 = arith.mulf %22, %26 : vector<256x256xf32>
    %cst_19 = arith.constant dense<0.000000e+00> : vector<16x256xf32>
    %28 = tpu.matmul %16, %27, %cst_19 {dimension_numbers = #tpu.dot_dimension_numbers<[1], [1], [0], [0], [0, 0, 1, 0], [], []>} : vector<16x256xf32>, vector<256x256xf32>, vector<16x256xf32> -> vector<16x256xf32>
    %c0_20 = arith.constant 0 : index
    %29 = memref.load %arg1[%c0_20] : memref<1xf32, #tpu.memory_space<smem>>
    %30 = vector.broadcast %29 : f32 to vector<16x256xf32>
    %31 = arith.mulf %30, %28 : vector<16x256xf32>
    %32 = arith.addf %31, %1 : vector<16x256xf32>
    %c0_21 = arith.constant 0 : index
    %c0_22 = arith.constant 0 : index
    %c0_23 = arith.constant 0 : index
    %33 = vector.load %arg9[%c0_21, %c0_22, %c0_23] : memref<1x16x256xf32, #tpu.memory_space<vmem>>, vector<1x16x256xf32>
    %34 = vector.shape_cast %33 : vector<1x16x256xf32> to vector<16x256xf32>
    %35 = vector.shape_cast %32 : vector<16x256xf32> to vector<1x16x256xf32>
    tpu.vector_store %arg9[%c0_21, %c0_22, %c0_23], %35 {strides = array<i32>} : memref<1x16x256xf32, #tpu.memory_space<vmem>>, vector<1x16x256xf32>,
    return
  }
  func.func @transform_0(%arg0: i32) -> i32 {
    %c0_i32 = arith.constant 0 : i32
    %c0_i32_0 = arith.constant 0 : i32
    return %c0_i32 : i32
  }
  func.func @transform_1(%arg0: i32) -> (i32, i32) {
    %c0_i32 = arith.constant 0 : i32
    %c0_i32_0 = arith.constant 0 : i32
    %c0_i32_1 = arith.constant 0 : i32
    return %c0_i32, %c0_i32_0 : i32, i32
  }
  func.func @transform_2(%arg0: i32) -> (i32, i32) {
    %c0_i32 = arith.constant 0 : i32
    %c0_i32_0 = arith.constant 0 : i32
    %c0_i32_1 = arith.constant 0 : i32
    return %c0_i32, %c0_i32_0 : i32, i32
  }
  func.func @transform_3(%arg0: i32) -> (i32, i32) {
    %c0_i32 = arith.constant 0 : i32
    %c0_i32_0 = arith.constant 0 : i32
    %c0_i32_1 = arith.constant 0 : i32
    return %c0_i32, %c0_i32_0 : i32, i32
  }
  func.func @transform_4(%arg0: i32) -> (i32, i32) {
    %c0_i32 = arith.constant 0 : i32
    %c0_i32_0 = arith.constant 0 : i32
    %c0_i32_1 = arith.constant 0 : i32
    return %c0_i32, %c0_i32_0 : i32, i32
  }
  func.func @transform_5(%arg0: i32) -> (i32, i32) {
    %c0_i32 = arith.constant 0 : i32
    %c0_i32_0 = arith.constant 0 : i32
    %c0_i32_1 = arith.constant 0 : i32
    return %c0_i32, %c0_i32_0 : i32, i32
  }
  func.func @transform_6(%arg0: i32) -> (i32, i32) {
    %c0_i32 = arith.constant 0 : i32
    %c0_i32_0 = arith.constant 0 : i32
    %c0_i32_1 = arith.constant 0 : i32
    return %c0_i32, %c0_i32_0 : i32, i32
  }
  func.func @transform_7(%arg0: i32) -> (i32, i32, i32) {
    %c0_i32 = arith.constant 0 : i32
    %c0_i32_0 = arith.constant 0 : i32
    %c0_i32_1 = arith.constant 0 : i32
    return %arg0, %c0_i32, %c0_i32_0 : i32, i32, i32
  }
  func.func @transform_8(%arg0: i32) -> (i32, i32, i32) {
    %c0_i32 = arith.constant 0 : i32
    %c0_i32_0 = arith.constant 0 : i32
    %c0_i32_1 = arith.constant 0 : i32
    return %arg0, %c0_i32, %c0_i32_0 : i32, i32, i32
  }
}

</mosaic_0001>

<bundles_post_ra>
// kernel: tpu_custom_call.1
= control target key start
LH: loop header
LB: loop body
LE: loop exit
PB: predicated region body
PF: predicated region fallthrough
CT: control target
= control target key end

     0   :  { %s2906_s0 = inlined_call_operand.<no memory space> [shape: f32[1], index: 0, kind: input, shape index: {}]   ;;  %s2907_s1 = inlined_call_operand.vmem [shape: f32[2,16], index: 1, kind: input, shape index: {}]   ;;  %s2908_s2 = inlined_call_operand.vmem [shape: f32[2,1], index: 2, kind: input, shape index: {}]   ;;  %s2909_s3 = inlined_call_operand.vmem [shape: f32[2,16], index: 3, kind: input, shape index: {}]   ;;  %s2910_s4 = inlined_call_operand.vmem [shape: f32[2,1], index: 4, kind: input, shape index: {}]   ;;  %s2911_s5 = inlined_call_operand.vmem [shape: f32[16,16], index: 5, kind: input, shape index: {}]   ;;  %s2912_s6 = inlined_call_operand.vmem [shape: f32[16,1], index: 6, kind: input, shape index: {}]   ;;  %s2913_s7 = inlined_call_operand.hbm [shape: f32[2,16,256], index: 7, kind: input, shape index: {}]   ;;  %s2914_s8 = inlined_call_operand.hbm [shape: f32[2,16,256], index: 8, kind: output, shape index: {}]  }
   0x1   :  { %13 = sst [smem:[#allocation2]] %s2906_s0 }
   0x2   :  { %14 = vsyncpa [#allocation4], 0 }
   0x3   :  { %16 = vsyncpa [#allocation4 + $0x1], 0 }
   0x4   :  { %17 = vsyncpa [#allocation5], 0 }
   0x5   :  { %19 = vsyncpa [#allocation5 + $0x1], 0  ;;  %s2126_s29 = smov 0   ;;  %s2128_s30 = smov 0  }
   0x6   :  { %s2130_s9 = smov 0   ;;  %s2132_s10 = smov 0  }
   0x7 LB: > { %s2147_s0 = sadd.s32 4294967295, %s2068_s10   ;;  %s1672_s11 = sadd.s32 4294967294, %s2068_s10   ;;  %s2068_s10 = sphi %s2132_s10, %s3015_s10   ;;  %s2064_s9 = sphi %s2130_s9, %s3014_s9   ;;  %s2060_s30 = sphi %s2128_s30, %s3013_s30   ;;  %s2056_s29 = sphi %s2126_s29, %s3012_s29  }
   0x8   : > { %s2151_s12 = sadd.s32 1, %s2068_s10   ;;  %s179_s13 = sadd.s32 1, %s2064_s9 }
   0x9   : > { %s176_s14 = ssub.s32 %s2068_s10, %s2151_s12  ;;  %p186_p0 = scmp.ne.s32.totalorder %s2064_s9, %s2060_s30 }
   0xa   : > { %p177_p1 = scmp.eq.s32.totalorder %s176_s14, 0  ;;  %p187_p2 = scmp.eq.s32.totalorder %s2068_s10, 0 }
   0xb   : > { %p192_p3 = scmp.ne.s32.totalorder %s2060_s30, %s2056_s29  ;;  %p193_p4 = scmp.eq.s32.totalorder %s2147_s0, 0 }
   0xc   : > { %s2163_s15 = scalar_select %p177_p1, %s2064_s9, %s179_s13  }
   0xd   : > { %p2165_p5 = por %p187_p2, %p186_p0  ;;  %p2169_p6 = por %p193_p4, %p192_p3 }
   0xe   : > { %p216_p7 = scmp.eq.s32.totalorder %s2147_s0, 1  ;;  %p222_p8 = scmp.eq.s32.totalorder %s1672_s11, 1 }
   0xf   : > { %s2947_s17 = scalar_select %p2169_p6, 1, 0 }
  0x10   : > { %p1738_p10 = scmp.lt.s32.totalorder %s2068_s10, 2  ;;  %p2176_p11 = por %p216_p7, %p186_p0 }
  0x11   : > { %p2180_p12 = por %p222_p8, %p192_p3  ;;  %s263_s20 = sand.u32 1, %s2064_s9  }
  0x12   : > { %s2948_s18 = scalar_select %p2176_p11, 1, 0 }
  0x13   : > { %s2949_s19 = scalar_select %p2180_p12, 1, 0 }
  0x14   : > { %s1724_s21 = sshll.u32 %s2068_s10, 9  ;;  %s1675_s22 = sshll.u32 %s263_s20, 5 }
  0x15   : > { %s2189_s25 = scalar_lea.hbm %s2913_s7, %s1724_s21  ;;  %s267_s26 = scalar_lea.vmem [#allocation3], %s1675_s22 }
  0x16   : > { %s274_s27 = sshll.u32 %s267_s26, 4  ;;  %p2193_p13 = pnand %p1738_p10, %p2165_p5  ;;  %s2197_s27 = int_to_ptr.vmem [resolvable:$true] %s274_s27 }
  0x17   : > { %s2199_s11 = scalar_lea.sflag [#allocation4], %s263_s20  ;;  %s1976_s13 = scalar_lea.hbm %s2189_s25, 512 }
  0x18   : > { %p1977_p0 = scmp.ne.s32.totalorder %s2189_s25, %s1976_s13  ;;  %p1978_p1 = pneg %p2193_p13 }
  0x19   : > { %s1981_s22 = scalar_lea.hbm %s2913_s7, 1024  ;;  %p1982_p4 = scmp.lt.s32.totalorder %s2189_s25, %s2913_s7 }
  0x1a   : > { %p1979_p2 = pnand %p1978_p1, %p1977_p0  ;;  %p1983_p5 = scmp.lt.s32.totalorder %s1981_s22, %s1976_s13 }
  0x1c   : > { %p1980_p3 = pneg %p1979_p2  ;;  %p1984_p7 = por %p1983_p5, %p1982_p4 }
  0x1e   : > { %p1985_p8 = pnand %p1984_p7, %p1980_p3 }
  0x20   : > { %1988 = shalt.err (!%p1985_p8)
}
  0x21   : > { %s1989_s20 = scalar_lea.vmem %s2197_s27, 512  ;;  %s2070_s24 = smov [#allocation3]  }
  0x22   : > { %p1990_p10 = scmp.ne.s32.totalorder %s2197_s27, %s1989_s20  ;;  %s1994_s26 = sshll.u32 %s2070_s24, 4  ;;  %s1995_s26 = int_to_ptr.vmem [resolvable:$false] %s1994_s26 }
  0x23   : > { %s1996_s14 = scalar_lea.vmem %s1995_s26, 1024  ;;  %p1997_p2 = scmp.lt.s32.totalorder %s2197_s27, %s1995_s26 }
  0x24   : > { %p1992_p9 = pnand %p1990_p10, %p1978_p1  ;;  %p1998_p12 = scmp.lt.s32.totalorder %s1996_s14, %s1989_s20 }
  0x26   : > { %p1993_p0 = pneg %p1992_p9  ;;  %p1999_p11 = por %p1998_p12, %p1997_p2 }
  0x28   : > { %p2000_p6 = pnand %p1999_p11, %p1993_p0 }
  0x2a   : > { %2003 = shalt.err (!%p2000_p6)
}
  0x2b   : > { %s2071_s13 = smov 256   ;;  %s2072_s21 = smov 16  }
  0x2c   : > { %1733 = dma.hbm_to_vmem [thread:$0]  (!%p2193_p13), %s2189_s25, 512, %s2197_s27, %s2199_s11, %s2071_s13, %s2071_s13, %s2072_s21  }
  0x2d   : > { %p1678_p9 = scmp.ge.s32.totalorder %s2068_s10, 1  ;;  %p282_p1 = scmp.lt.s32.totalorder %s2068_s10, 3 }
  0x2f   : > { %p283_p3 = pnand %p1678_p9, %p282_p1 }
  0x31   : > { %286 = sbr.rel (%p283_p3) target bundleno = 1366 (0x556), region = 52 }
  0x36   : > { %s2223_s22 = sand.u32 1, %s2060_s30   ;;  %p2951_p6 = scmp.ne.s32.totalorder %s2947_s17, 0 }
  0x37   : > { %s1679_s16 = sshll.u32 %s2223_s22, 5  ;;  %s289_s23 = scalar_lea.sflag [#allocation4], %s2223_s22 }
  0x38   : > { %s2229_s20 = scalar_lea.vmem [#allocation3], %s1679_s16 }
  0x39   : > { %2047 = dma.done.wait (%p2951_p6), %s289_s23, 512  }
  0x3a   : > { %2049 = vsyncadd (%p2951_p6), %s289_s23, 4294966784  ;;  %v2917_v0 = vmov 0.0   ;;  %v2074_v1 = vmov 0   ;;  %v328_v2 = vld [vmem:[%s2229_s20 + $0x18] sm:$0xff]  ;;  %v327_v3 = vld [vmem:[%s2229_s20 + $0x10] sm:$0xff]  ;;  %vm336_vm0 = vcmask 130048  }
  0x3b   : > { %404 = vmatprep.mubr.f32.mxu1 %v2917_v0  ;;  %1778 = vset.pattern.permute.xlu0 %v2074_v1  ;;  %v326_v4 = vld [vmem:[%s2229_s20 + $0x8] sm:$0xff]  ;;  %v325_v5 = vld [vmem:[%s2229_s20] sm:$0xff]  ;;  %vm750_vm1 = vcmask 1041408   ;;  %vm653_vm2 = vcmask 15360   ;;  %s1571_s24 = sld [smem:[#allocation2]]  ;;  %s324_s26 = scalar_lea.vmem [#allocation6], %s1679_s16 }
  0x3c   : > { %576 = vmatprep.mubr.f32.mxu0 %v2917_v0  ;;  %368 = vmatprep.subr.mxu1 %v328_v2  ;;  %v329_v6 = vld [vmem:[%s2907_s1] sm:$0x3]  ;;  %s1599_s14 = sshll.u32 %s324_s26, 4  ;;  %s1725_s13 = sshll.u32 %s2147_s0, 9  ;;  %s2856_s14 = int_to_ptr.vmem [resolvable:$true] %s1599_s14 }
  0x3d   : > { %540 = vmatprep.subr.mxu0 %v328_v2  ;;  %369 = vmatpush1.msra.mxu1 %v327_v3  ;;  %v330_v7 = vld [vmem:[%s2908_s2] sm:$0x3]  ;;  %s2862_s23 = scalar_lea.hbm %s2914_s8, %s1725_s13  ;;  %s1586_s0 = scalar_lea.sflag [#allocation5], %s2223_s22 }
  0x3e   : > { %541 = vmatpush1.msra.mxu0 %v327_v3  ;;  %370 = vmatprep.subr.mxu1 %v326_v4  ;;  %v412_v8 = vld [vmem:[%s2910_s4] sm:$0x3]  ;;  %s2004_s17 = scalar_lea.vmem %s2856_s14, 512  ;;  %p3009_p12 = scmp.ne.s32.totalorder %s2948_s18, 0 }
  0x3f   : > { %333 = vperm.xlu0 %1778, %v330_v7   ;;  %371 = vmatpush1.msra.mxu1 %v325_v5  ;;  %v411_v9 = vld [vmem:[%s2909_s3] sm:$0x3]  ;;  %p2005_p11 = scmp.ne.s32.totalorder %s2856_s14, %s2004_s17  ;;  %s2075_s25 = smov [#allocation6]  }
  0x40   : > { %542 = vmatprep.subr.mxu0 %v326_v4  ;;  %1681 = vmatmul.mubr.msk.f32.vlgmr.msra.gmra.mxu1 %vm336_vm0, %v329_v6  ;;  %s2008_s27 = sshll.u32 %s2075_s25, 4  ;;  %s2009_s27 = int_to_ptr.vmem [resolvable:$false] %s2008_s27 }
  0x41   : > { %449 = vmatprep.subr.mxu1 %v328_v2  ;;  %485 = vmatprep.mubr.f32.mxu1 %v2917_v0  ;;  %p2006_p13 = pnand %p2005_p11, %p3009_p12  ;;  %s2010_s28 = scalar_lea.vmem %s2009_s27, 1024 }
  0x42   : > { %450 = vmatpush1.msra.mxu1 %v327_v3  ;;  %543 = vmatpush1.msra.mxu0 %v325_v5  ;;  %p2011_p5 = scmp.lt.s32.totalorder %s2856_s14, %s2009_s27  ;;  %p2012_p7 = scmp.lt.s32.totalorder %s2010_s28, %s2004_s17 }
  0x43   : > { %451 = vmatprep.subr.mxu1 %v326_v4  ;;  %415 = vperm.xlu0 %1778, %v412_v8   ;;  %p2007_p4 = pneg %p2006_p13 }
  0x44   : > { %452 = vmatpush1.msra.mxu1 %v325_v5  ;;  %p2013_p8 = por %p2012_p7, %p2011_p5 }
  0x45   : > { %1682 = vmatmul.mubr.msk.f32.vlgmr.msra.gmra.mxu1 %vm336_vm0, %v411_v9 }
  0x46   : > { %821 = vmatprep.mubr.f32.mxu1 %v2917_v0  ;;  %p2014_p10 = pnand %p2013_p8, %p2007_p4 }
  0xba   : > { %v334_v10 = vpop.permute.xlu0 %333 }
  0xbe   : > { %v416_v15 = vpop.permute.xlu0 %415 }
 0x100   : > { %v406_v11 = vpop.f32.mrf.mxu1 }
 0x101   : > { %v407_v12 = vadd.f32 %v406_v11, %v334_v10 }
 0x102   : > { %v408_v13 = vpop.f32.mrf.mxu1 }
 0x103   : > { %589 = vxpose.xlu1.b32.start.end [1/1] (short) %v407_v12, 128  ;;  %v409_v19 = vadd.f32 %v408_v13, %v334_v10 }
 0x105   : > { %v487_v14 = vpop.f32.mrf.mxu1 }
 0x106   : > { %v488_v18 = vadd.f32 %v487_v14, %v416_v15 }
 0x107   : > { %v489_v16 = vpop.f32.mrf.mxu1 }
 0x108   : > { %v490_v17 = vadd.f32 %v489_v16, %v416_v15 }
 0x10a   : > { %1685 = vmatprep.subr.msk.mxu1 %vm750_vm1, %v490_v17 }
 0x10b   : > { %1686 = vmatpush1.msk.msra.mxu1 %vm750_vm1, %v488_v18 }
 0x140   : > { %621 = vxpose.xlu1.b32.start.end [1/1] (short) %v409_v19, 128 }
 0x15e   : > { %1779 = vset.pattern.permute.xlu1 %v2074_v1 }
 0x17f   : > { %v605_v20 = vpop.trf.xlu1 }
 0x180   : > { %1687 = vmatmul.mubr.msk.f32.vlgmr.msra.gmra.mxu1 %vm653_vm2, %v605_v20 }
 0x181   : > { %827 = vmatprep.mubr.f32.mxu1 %v2917_v0 }
 0x183   : > { %v606_v21 = vpop.trf.xlu1 }
 0x184   : > { %1688 = vmatmul.mubr.msk.f32.gmra.mxu1 %vm653_vm2, %v606_v21 }
 0x185   : > { %833 = vmatprep.mubr.f32.mxu1 %v2917_v0 }
 0x187   : > { %v607_v22 = vpop.trf.xlu1 }
 0x188   : > { %1689 = vmatmul.mubr.msk.f32.gmra.mxu1 %vm653_vm2, %v607_v22 }
 0x189   : > { %839 = vmatprep.mubr.f32.mxu1 %v2917_v0 }
 0x18b   : > { %v608_v23 = vpop.trf.xlu1 }
 0x18c   : > { %1690 = vmatmul.mubr.msk.f32.gmra.mxu1 %vm653_vm2, %v608_v23 }
 0x18d   : > { %845 = vmatprep.mubr.f32.mxu1 %v2917_v0 }
 0x18f   : > { %v609_v24 = vpop.trf.xlu1 }
 0x190   : > { %1691 = vmatmul.mubr.msk.f32.gmra.mxu1 %vm653_vm2, %v609_v24 }
 0x191   : > { %851 = vmatprep.mubr.f32.mxu1 %v2917_v0 }
 0x193   : > { %v610_v25 = vpop.trf.xlu1 }
 0x194   : > { %1692 = vmatmul.mubr.msk.f32.gmra.mxu1 %vm653_vm2, %v610_v25 }
 0x195   : > { %857 = vmatprep.mubr.f32.mxu1 %v2917_v0 }
 0x197   : > { %v611_v26 = vpop.trf.xlu1 }
 0x198   : > { %1693 = vmatmul.mubr.msk.f32.gmra.mxu1 %vm653_vm2, %v611_v26 }
 0x199   : > { %863 = vmatprep.mubr.f32.mxu1 %v2917_v0 }
 0x19b   : > { %v612_v27 = vpop.trf.xlu1 }
 0x19c   : > { %1694 = vmatmul.mubr.msk.f32.gmra.mxu1 %vm653_vm2, %v612_v27 }
 0x19d   : > { %869 = vmatprep.mubr.f32.mxu1 %v2917_v0 }
 0x19f   : > { %v613_v28 = vpop.trf.xlu1 }
 0x1a0   : > { %1695 = vmatmul.mubr.msk.f32.gmra.mxu1 %vm653_vm2, %v613_v28 }
 0x1a1   : > { %875 = vmatprep.mubr.f32.mxu1 %v2917_v0 }
 0x1a3   : > { %v614_v29 = vpop.trf.xlu1 }
 0x1a4   : > { %1696 = vmatmul.mubr.msk.f32.gmra.mxu1 %vm653_vm2, %v614_v29 }
 0x1a5   : > { %881 = vmatprep.mubr.f32.mxu1 %v2917_v0 }
 0x1a7   : > { %v615_v30 = vpop.trf.xlu1 }
 0x1a8   : > { %1697 = vmatmul.mubr.msk.f32.gmra.mxu1 %vm653_vm2, %v615_v30 }
 0x1a9   : > { %887 = vmatprep.mubr.f32.mxu1 %v2917_v0 }
 0x1ab   : > { %v616_v31 = vpop.trf.xlu1 }
 0x1ac   : > { %1698 = vmatmul.mubr.msk.f32.gmra.mxu1 %vm653_vm2, %v616_v31 }
 0x1ad   : > { %893 = vmatprep.mubr.f32.mxu1 %v2917_v0 }
 0x1af   : > { %v617_v32 = vpop.trf.xlu1 }
 0x1b0   : > { %1699 = vmatmul.mubr.msk.f32.gmra.mxu1 %vm653_vm2, %v617_v32 }
 0x1b1   : > { %899 = vmatprep.mubr.f32.mxu1 %v2917_v0 }
 0x1b3   : > { %v618_v33 = vpop.trf.xlu1 }
 0x1b4   : > { %1700 = vmatmul.mubr.msk.f32.gmra.mxu1 %vm653_vm2, %v618_v33 }
 0x1b5   : > { %905 = vmatprep.mubr.f32.mxu1 %v2917_v0 }
 0x1b7   : > { %v619_v34 = vpop.trf.xlu1 }
 0x1b8   : > { %1701 = vmatmul.mubr.msk.f32.gmra.mxu1 %vm653_vm2, %v619_v34 }
 0x1b9   : > { %911 = vmatprep.mubr.f32.mxu1 %v2917_v0 }
 0x1bb   : > { %v620_v35 = vpop.trf.xlu1 }
 0x1bc   : > { %1702 = vmatmul.mubr.msk.f32.gmra.mxu1 %vm653_vm2, %v620_v35 }
 0x1bd   : > { %917 = vmatprep.mubr.f32.mxu1 %v2917_v0 }
 0x1bf   : > { %v637_v36 = vpop.trf.xlu1 }
 0x1c0   : > { %1703 = vmatmul.mubr.msk.f32.gmra.mxu1 %vm653_vm2, %v637_v36 }
 0x1c1   : > { %923 = vmatprep.mubr.f32.mxu1 %v2917_v0 }
 0x1c3   : > { %v638_v37 = vpop.trf.xlu1 }
 0x1c4   : > { %1704 = vmatmul.mubr.msk.f32.gmra.mxu1 %vm653_vm2, %v638_v37 }
 0x1c5   : > { %929 = vmatprep.mubr.f32.mxu1 %v2917_v0 }
 0x1c7   : > { %v639_v38 = vpop.trf.xlu1 }
 0x1c8   : > { %1705 = vmatmul.mubr.msk.f32.gmra.mxu1 %vm653_vm2, %v639_v38 }
 0x1c9   : > { %935 = vmatprep.mubr.f32.mxu1 %v2917_v0 }
 0x1cb   : > { %v640_v39 = vpop.trf.xlu1 }
 0x1cc   : > { %1706 = vmatmul.mubr.msk.f32.gmra.mxu1 %vm653_vm2, %v640_v39 }
 0x1cd   : > { %941 = vmatprep.mubr.f32.mxu1 %v2917_v0 }
 0x1cf   : > { %v641_v40 = vpop.trf.xlu1 }
 0x1d0   : > { %1707 = vmatmul.mubr.msk.f32.gmra.mxu1 %vm653_vm2, %v641_v40 }
 0x1d1   : > { %947 = vmatprep.mubr.f32.mxu1 %v2917_v0 }
 0x1d3   : > { %v642_v41 = vpop.trf.xlu1 }
 0x1d4   : > { %1708 = vmatmul.mubr.msk.f32.gmra.mxu1 %vm653_vm2, %v642_v41 }
 0x1d5   : > { %953 = vmatprep.mubr.f32.mxu1 %v2917_v0 }
 0x1d7   : > { %v643_v42 = vpop.trf.xlu1 }
 0x1d8   : > { %1709 = vmatmul.mubr.msk.f32.gmra.mxu1 %vm653_vm2, %v643_v42 }
 0x1d9   : > { %959 = vmatprep.mubr.f32.mxu1 %v2917_v0 }
 0x1db   : > { %v644_v43 = vpop.trf.xlu1 }
 0x1dc   : > { %1710 = vmatmul.mubr.msk.f32.gmra.mxu1 %vm653_vm2, %v644_v43 }
 0x1dd   : > { %965 = vmatprep.mubr.f32.mxu1 %v2917_v0 }
 0x1df   : > { %v645_v44 = vpop.trf.xlu1 }
 0x1e0   : > { %1711 = vmatmul.mubr.msk.f32.gmra.mxu1 %vm653_vm2, %v645_v44 }
 0x1e1   : > { %971 = vmatprep.mubr.f32.mxu1 %v2917_v0 }
 0x1e3   : > { %v646_v45 = vpop.trf.xlu1 }
 0x1e4   : > { %1712 = vmatmul.mubr.msk.f32.gmra.mxu1 %vm653_vm2, %v646_v45 }
 0x1e5   : > { %977 = vmatprep.mubr.f32.mxu1 %v2917_v0 }
 0x1e7   : > { %v647_v46 = vpop.trf.xlu1 }
 0x1e8   : > { %1713 = vmatmul.mubr.msk.f32.gmra.mxu1 %vm653_vm2, %v647_v46 }
 0x1e9   : > { %983 = vmatprep.mubr.f32.mxu1 %v2917_v0 }
 0x1eb   : > { %v648_v47 = vpop.trf.xlu1 }
 0x1ec   : > { %1714 = vmatmul.mubr.msk.f32.gmra.mxu1 %vm653_vm2, %v648_v47 }
 0x1ed   : > { %989 = vmatprep.mubr.f32.mxu1 %v2917_v0 }
 0x1ef   : > { %v649_v48 = vpop.trf.xlu1 }
 0x1f0   : > { %1715 = vmatmul.mubr.msk.f32.gmra.mxu1 %vm653_vm2, %v649_v48 }
 0x1f1   : > { %995 = vmatprep.mubr.f32.mxu1 %v2917_v0 }
 0x1f3   : > { %v650_v49 = vpop.trf.xlu1 }
 0x1f4   : > { %1716 = vmatmul.mubr.msk.f32.gmra.mxu1 %vm653_vm2, %v650_v49 }
 0x1f5   : > { %1001 = vmatprep.mubr.f32.mxu1 %v2917_v0 }
 0x1f7   : > { %v651_v50 = vpop.trf.xlu1 }
 0x1f8   : > { %1717 = vmatmul.mubr.msk.f32.gmra.mxu1 %vm653_vm2, %v651_v50 }
 0x1f9   : > { %1007 = vmatprep.mubr.f32.mxu1 %v2917_v0 }
 0x1fb   : > { %v652_v51 = vpop.trf.xlu1 }
 0x1fc   : > { %1718 = vmatmul.mubr.msk.f32.gmra.mxu1 %vm653_vm2, %v652_v51 }
 0x240   : > { %v2320_v52 = vpop.f32.mrf.mxu1 }
 0x242   : > { %v2322_v53 = vpop.f32.mrf.mxu1 }
 0x244   : > { %v2324_v54 = vpop.f32.mrf.mxu1 }
 0x246   : > { %v2326_v55 = vpop.f32.mrf.mxu1 }
 0x248   : > { %v2328_v56 = vpop.f32.mrf.mxu1 }
 0x24a   : > { %v2330_v57 = vpop.f32.mrf.mxu1 }
 0x24c   : > { %v2332_v58 = vpop.f32.mrf.mxu1 }
 0x24e   : > { %v2334_v59 = vpop.f32.mrf.mxu1 }
 0x24f   : > { %v1023_v51 = vmax.f32 %v2332_v58, %v2334_v59 }
 0x250   : > { %v2336_v60 = vpop.f32.mrf.mxu1 }
 0x252   : > { %v2338_v61 = vpop.f32.mrf.mxu1 }
 0x253   : > { %v1026_v47 = vmax.f32 %v2336_v60, %v2338_v61 }
 0x254   : > { %v2340_v62 = vpop.f32.mrf.mxu1 }
 0x256   : > { %v2342_v63 = vpop.f32.mrf.mxu1 }
 0x257   : > { %v1029_v43 = vmax.f32 %v2340_v62, %v2342_v63 }
 0x258   : > { %v2344_v1 = vpop.f32.mrf.mxu1 }
 0x25a   : > { %v2346_v2 = vpop.f32.mrf.mxu1 }
 0x25b   : > { %v1032_v38 = vmax.f32 %v2344_v1, %v2346_v2 }
 0x25c   : > { %v2348_v3 = vpop.f32.mrf.mxu1 }
 0x25e   : > { %v2350_v4 = vpop.f32.mrf.mxu1 }
 0x25f   : > { %v1035_v5 = vmax.f32 %v2348_v3, %v2350_v4 }
 0x260   : > { %v2354_v6 = vpop.f32.mrf.mxu1 }
 0x261   : > { %1036 = vmax.xlane.f32.xlu1 %v1035_v5 }
 0x262   : > { %v2356_v7 = vpop.f32.mrf.mxu1 }
 0x263   : > { %v1038_v35 = vmax.f32 %v2354_v6, %v2356_v7 }
 0x264   : > { %v2358_v8 = vpop.f32.mrf.mxu1 }
 0x266   : > { %v2360_v9 = vpop.f32.mrf.mxu1 }
 0x267   : > { %v1041_v32 = vmax.f32 %v2358_v8, %v2360_v9 }
 0x268   : > { %v2362_v10 = vpop.f32.mrf.mxu1 }
 0x26a   : > { %v2364_v11 = vpop.f32.mrf.mxu1 }
 0x26b   : > { %v1044_v29 = vmax.f32 %v2362_v10, %v2364_v11 }
 0x26c   : > { %v2366_v12 = vpop.f32.mrf.mxu1 }
 0x26e   : > { %v2368_v13 = vpop.f32.mrf.mxu1 }
 0x26f   : > { %v1047_v14 = vmax.f32 %v2366_v12, %v2368_v13 }
 0x270   : > { %v2372_v15 = vpop.f32.mrf.mxu1 }
 0x271   : > { %1048 = vmax.xlane.f32.xlu0 %v1047_v14 }
 0x272   : > { %v2374_v16 = vpop.f32.mrf.mxu1 }
 0x273   : > { %v1050_v17 = vmax.f32 %v2372_v15, %v2374_v16 }
 0x274   : > { %v2378_v18 = vpop.f32.mrf.mxu1 }
 0x275   : > { %1051 = vmax.xlane.f32.xlu0 %v1050_v17  ;;  %v1020_v17 = vmax.f32 %v2328_v56, %v2330_v57 }
 0x276   : > { %v2380_v19 = vpop.f32.mrf.mxu1 }
 0x277   : > { %v1053_v20 = vmax.f32 %v2378_v18, %v2380_v19 }
 0x278   : > { %v2384_v21 = vpop.f32.mrf.mxu1 }
 0x279   : > { %1054 = vmax.xlane.f32.xlu0 %v1053_v20 }
 0x27a   : > { %v2386_v22 = vpop.f32.mrf.mxu1 }
 0x27b   : > { %v1056_v23 = vmax.f32 %v2384_v21, %v2386_v22 }
 0x27c   : > { %v2390_v24 = vpop.f32.mrf.mxu1 }
 0x27d   : > { %1057 = vmax.xlane.f32.xlu0 %v1056_v23 }
 0x27e   : > { %v2392_v25 = vpop.f32.mrf.mxu1 }
 0x27f   : > { %v1059_v26 = vmax.f32 %v2390_v24, %v2392_v25 }
 0x280   : > { %v2396_v27 = vpop.f32.mrf.mxu1 }
 0x281   : > { %2952 = vst [vmem:[#allocation9_spill] sm:$0xff] %v2396_v27  ;;  %1060 = vmax.xlane.f32.xlu0 %v1059_v26  ;;  %v1017_v26 = vmax.f32 %v2324_v54, %v2326_v55 }
 0x282   : > { %v2398_v28 = vpop.f32.mrf.mxu1 }
 0x283   : > { %2953 = vst [vmem:[#allocation10_spill] sm:$0xff] %v2398_v28  ;;  %v1062_v49 = vmax.f32 %v2396_v27, %v2398_v28 }
 0x284   : > { %v2402_v30 = vpop.f32.mrf.mxu1 }
 0x285   : > { %2954 = vst [vmem:[#allocation11_spill] sm:$0xff] %v2402_v30  ;;  %1045 = vmax.xlane.f32.xlu0 %v1044_v29 }
 0x286   : > { %v2404_v31 = vpop.f32.mrf.mxu1 }
 0x287   : > { %2955 = vst [vmem:[#allocation12_spill] sm:$0xff] %v2404_v31  ;;  %v1065_v45 = vmax.f32 %v2402_v30, %v2404_v31 }
 0x288   : > { %v2408_v33 = vpop.f32.mrf.mxu1 }
 0x289   : > { %2956 = vst [vmem:[#allocation13_spill] sm:$0xff] %v2408_v33  ;;  %1042 = vmax.xlane.f32.xlu0 %v1041_v32 }
 0x28a   : > { %v2410_v34 = vpop.f32.mrf.mxu1 }
 0x28b   : > { %2957 = vst [vmem:[#allocation14_spill] sm:$0xff] %v2410_v34  ;;  %v1068_v41 = vmax.f32 %v2408_v33, %v2410_v34  ;;  %v2967_v33 = vmov 0.0  }
 0x28c   : > { %v2414_v36 = vpop.f32.mrf.mxu1 }
 0x28d   : > { %2958 = vst [vmem:[#allocation15_spill] sm:$0xff] %v2414_v36  ;;  %1039 = vmax.xlane.f32.xlu0 %v1038_v35  ;;  %v1014_v35 = vmax.f32 %v2320_v52, %v2322_v53 }
 0x28e   : > { %v2416_v37 = vpop.f32.mrf.mxu1 }
 0x28f   : > { %2959 = vst [vmem:[#allocation16_spill] sm:$0xff] %v2416_v37  ;;  %v1071_v39 = vmax.f32 %v2414_v36, %v2416_v37 }
 0x290   : > { %v2422_v40 = vpop.f32.mrf.mxu1 }
 0x291   : > { %1033 = vmax.xlane.f32.xlu0 %v1032_v38  ;;  %1072 = vmax.xlane.f32.xlu1 %v1071_v39 }
 0x292   : > { %v2426_v42 = vpop.f32.mrf.mxu1 }
 0x294   : > { %v2430_v44 = vpop.f32.mrf.mxu1 }
 0x295   : > { %1030 = vmax.xlane.f32.xlu0 %v1029_v43  ;;  %1069 = vmax.xlane.f32.xlu1 %v1068_v41 }
 0x296   : > { %v2434_v46 = vpop.f32.mrf.mxu1 }
 0x298   : > { %v2438_v48 = vpop.f32.mrf.mxu1 }
 0x299   : > { %2960 = vst [vmem:[#allocation17_spill] sm:$0xff] %v2438_v48  ;;  %1027 = vmax.xlane.f32.xlu0 %v1026_v47  ;;  %1066 = vmax.xlane.f32.xlu1 %v1065_v45 }
 0x29a   : > { %v2442_v50 = vpop.f32.mrf.mxu1 }
 0x29b   : > { %2961 = vst [vmem:[#allocation18_spill] sm:$0xff] %v2442_v50 }
 0x29c   : > { %v2446_v5 = vpop.f32.mrf.mxu1 }
 0x29d   : > { %2962 = vst [vmem:[#allocation19_spill] sm:$0xff] %v2446_v5  ;;  %1024 = vmax.xlane.f32.xlu0 %v1023_v51  ;;  %1063 = vmax.xlane.f32.xlu1 %v1062_v49 }
 0x29e   : > { %v2448_v14 = vpop.f32.mrf.mxu1 }
 0x29f   : > { %2963 = vst [vmem:[#allocation20_spill] sm:$0xff] %v2448_v14  ;;  %v1083_v30 = vmax.f32 %v2446_v5, %v2448_v14 }
 0x2a0   : > { %v2452_v20 = vpop.f32.mrf.mxu1 }
 0x2a1   : > { %2964 = vst [vmem:[#allocation21_spill] sm:$0xff] %v2452_v20  ;;  %1021 = vmax.xlane.f32.xlu0 %v1020_v17 }
 0x2a2   : > { %v2454_v23 = vpop.f32.mrf.mxu1 }
 0x2a3   : > { %2965 = vst [vmem:[#allocation22_spill] sm:$0xff] %v2454_v23 }
 0x2a4   : > { %v2458_v29 = vpop.f32.mrf.mxu1 }
 0x2a5   : > { %1018 = vmax.xlane.f32.xlu0 %v1017_v26 }
 0x2a6   : > { %v2460_v32 = vpop.f32.mrf.mxu1 }
 0x2a7   : > { %2966 = vst [vmem:[#allocation23_spill] sm:$0xff] %v2460_v32  ;;  %v1089_v31 = vmax.f32 %v2458_v29, %v2460_v32 }
 0x2a8   : > { %v2464_v38 = vpop.f32.mrf.mxu1 }
 0x2a9   : > { %1015 = vmax.xlane.f32.xlu0 %v1014_v35 }
 0x2aa   : > { %v2466_v39 = vpop.f32.mrf.mxu1 }
 0x2ab   : > { %v1092_v41 = vmax.f32 %v2464_v38, %v2466_v39 }
 0x2ac   : > { %v2470_v43 = vpop.f32.mrf.mxu1 }
 0x2ad   : > { %1093 = vmax.xlane.f32.xlu0 %v1092_v41 }
 0x2ae   : > { %v2472_v45 = vpop.f32.mrf.mxu1 }
 0x2af   : > { %v1095_v47 = vmax.f32 %v2470_v43, %v2472_v45 }
 0x2b0   : > { %v2476_v49 = vpop.f32.mrf.mxu1 }
 0x2b1   : > { %1096 = vmax.xlane.f32.xlu0 %v1095_v47 }
 0x2b2   : > { %v2478_v51 = vpop.f32.mrf.mxu1 }
 0x2b3   : > { %v1098_v17 = vmax.f32 %v2476_v49, %v2478_v51 }
 0x2b4   : > { %v2482_v26 = vpop.f32.mrf.mxu1 }
 0x2b5   : > { %1099 = vmax.xlane.f32.xlu0 %v1098_v17 }
 0x2b6   : > { %v2484_v35 = vpop.f32.mrf.mxu1 }
 0x2b7   : > { %v1101_v41 = vmax.f32 %v2482_v26, %v2484_v35 }
 0x2b8   : > { %v2488_v0 = vpop.f32.mrf.mxu1 }
 0x2b9   : > { %1102 = vmax.xlane.f32.xlu0 %v1101_v41  ;;  %v1086_v41 = vmax.f32 %v2452_v20, %v2454_v23 }
 0x2ba   : > { %v2490_v28 = vpop.f32.mrf.mxu1 }
 0x2bb   : > { %v1104_v47 = vmax.f32 %v2488_v0, %v2490_v28 }
 0x2bc   : > { %v2494_v27 = vpop.f32.mrf.mxu1 }
 0x2bd   : > { %1105 = vmax.xlane.f32.xlu0 %v1104_v47  ;;  %v1080_v47 = vmax.f32 %v2438_v48, %v2442_v50 }
 0x2be   : > { %v2496_v34 = vpop.f32.mrf.mxu1 }
 0x2bf   : > { %v1107_v17 = vmax.f32 %v2494_v27, %v2496_v34 }
 0x2c1   : > { %1108 = vmax.xlane.f32.xlu0 %v1107_v17  ;;  %v492_v17 = vld [vmem:[%s2911_s5] sm:$0xff] }
 0x2c2   : > { %1683 = vmatmul.mubr.msk.f32.vlgmr.msra.gmra.mxu0 %vm336_vm0, %v492_v17 }
 0x2c3   : > { %582 = vmatprep.mubr.f32.mxu0 %v2967_v33 }
 0x2c5   : > { %1090 = vmax.xlane.f32.xlu0 %v1089_v31 }
 0x2c9   : > { %1087 = vmax.xlane.f32.xlu0 %v1086_v41 }
 0x2cd   : > { %1084 = vmax.xlane.f32.xlu0 %v1083_v30 }
 0x2d1   : > { %1081 = vmax.xlane.f32.xlu0 %v1080_v47 }
 0x2fa   : > { %v1049_v31 = vpop.xlane.xlu0 %1048 }
 0x2fe   : > { %v1052_v37 = vpop.xlane.xlu0 %1051 }
 0x2ff   : > { %v1134_v17 = vsub.f32 %v2372_v15, %v1052_v37  ;;  %v1135_v20 = vsub.f32 %v2374_v16, %v1052_v37  ;;  %v1132_v15 = vsub.f32 %v2366_v12, %v1049_v31 }
 0x302   : > { %v1055_v36 = vpop.xlane.xlu0 %1054 }
 0x303   : > { %v1136_v41 = vsub.f32 %v2378_v18, %v1055_v36  ;;  %v1137_v14 = vsub.f32 %v2380_v19, %v1055_v36  ;;  %v1222_v36 = vmul.f32 1.442695, %v1134_v17 }
 0x305   : > { %v1226_v30 = vmul.f32 1.442695, %v1136_v41  ;;  %v1228_v5 = vmul.f32 1.442695, %v1137_v14 }
 0x306   : > { %v1058_v23 = vpop.xlane.xlu0 %1057 }
 0x307   : > { %1780 = vpow2.f32 %v1226_v30  ;;  %v1138_v47 = vsub.f32 %v2384_v21, %v1058_v23  ;;  %v1139_v50 = vsub.f32 %v2386_v22, %v1058_v23  ;;  %v1224_v21 = vmul.f32 1.442695, %v1135_v20 }
 0x308   : > { %1782 = vpow2.f32 %v1228_v5  ;;  %v1133_v22 = vsub.f32 %v2368_v13, %v1049_v31 }
 0x309   : > { %v1230_v48 = vmul.f32 1.442695, %v1138_v47  ;;  %v1232_v33 = vmul.f32 1.442695, %v1139_v50 }
 0x30a   : > { %v1061_v32 = vpop.xlane.xlu0 %1060 }
 0x30b   : > { %1784 = vpow2.f32 %v1230_v48  ;;  %v1140_v18 = vsub.f32 %v2390_v24, %v1061_v32  ;;  %v1141_v19 = vsub.f32 %v2392_v25, %v1061_v32  ;;  %v1218_v25 = vmul.f32 1.442695, %v1132_v15 }
 0x30c   : > { %1786 = vpow2.f32 %v1232_v33  ;;  %v1220_v48 = vmul.f32 1.442695, %v1133_v22 }
 0x30d   : > { %v1234_v14 = vmul.f32 1.442695, %v1140_v18  ;;  %v1236_v41 = vmul.f32 1.442695, %v1141_v19 }
 0x30e   : > { %v1046_v30 = vpop.xlane.xlu0 %1045 }
 0x30f   : > { %1788 = vpow2.f32 %v1234_v14  ;;  %v1130_v23 = vsub.f32 %v2362_v10, %v1046_v30  ;;  %v1131_v13 = vsub.f32 %v2364_v11, %v1046_v30 }
 0x310   : > { %1790 = vpow2.f32 %v1236_v41 }
 0x311   : > { %1792 = vpow2.f32 %v1222_v36  ;;  %v1214_v17 = vmul.f32 1.442695, %v1130_v23  ;;  %v1216_v19 = vmul.f32 1.442695, %v1131_v13 }
 0x312   : > { %1794 = vpow2.f32 %v1224_v21  ;;  %v1043_v16 = vpop.xlane.xlu0 %1042 }
 0x313   : > { %1796 = vpow2.f32 %v1218_v25  ;;  %v1128_v18 = vsub.f32 %v2358_v8, %v1043_v16  ;;  %v1129_v36 = vsub.f32 %v2360_v9, %v1043_v16 }
 0x314   : > { %v2523_v37 = vpop.eup %1780  ;;  %1798 = vpow2.f32 %v1220_v48  ;;  %v1037_v48 = vpop.xlane.xlu1 %1036 }
 0x315   : > { %v2525_v24 = vpop.eup %1782  ;;  %1800 = vpow2.f32 %v1214_v17  ;;  %v1210_v15 = vmul.f32 1.442695, %v1128_v18  ;;  %v1212_v9 = vmul.f32 1.442695, %v1129_v36  ;;  %v1077_v17 = vmax.f32 %v2430_v44, %v2434_v46 }
 0x316   : > { %v1040_v50 = vpop.xlane.xlu0 %1039  ;;  %v1341_v5 = vadd.f32 %v2525_v24, %v2523_v37  ;;  %1802 = vpow2.f32 %v1216_v19 }
 0x317   : > { %v1126_v8 = vsub.f32 %v2354_v6, %v1040_v50  ;;  %v1127_v16 = vsub.f32 %v2356_v7, %v1040_v50  ;;  %v1125_v7 = vsub.f32 %v2350_v4, %v1037_v48 }
 0x318   : > { %v2529_v20 = vpop.eup %1784  ;;  %1342 = vadd.xlane.f32.xlu0 %v1341_v5 }
 0x319   : > { %v2532_v12 = vpop.eup %1786  ;;  %v1206_v6 = vmul.f32 1.442695, %v1126_v8  ;;  %v1208_v50 = vmul.f32 1.442695, %v1127_v16 }
 0x31a   : > { %v1034_v32 = vpop.xlane.xlu0 %1033  ;;  %v1344_v31 = vadd.f32 %v2532_v12, %v2529_v20 }
 0x31b   : > { %v1122_v19 = vsub.f32 %v2344_v1, %v1034_v32 }
 0x31c   : > { %v2537_v47 = vpop.eup %1788  ;;  %1345 = vadd.xlane.f32.xlu0 %v1344_v31 }
 0x31d   : > { %v2539_v33 = vpop.eup %1790 }
 0x31e   : > { %v2542_v10 = vpop.eup %1792  ;;  %v1031_v14 = vpop.xlane.xlu0 %1030  ;;  %v1347_v11 = vadd.f32 %v2539_v33, %v2537_v47 }
 0x31f   : > { %v2547_v41 = vpop.eup %1794  ;;  %v1120_v21 = vsub.f32 %v2340_v62, %v1031_v14  ;;  %v1121_v30 = vsub.f32 %v2342_v63, %v1031_v14  ;;  %v493_v62 = vld [vmem:[%s2911_s5 + $0x8] sm:$0xff]  ;;  %v1124_v63 = vsub.f32 %v2348_v3, %v1037_v48  ;;  %v1123_v14 = vsub.f32 %v2346_v2, %v1034_v32 }
 0x320   : > { %1348 = vadd.xlane.f32.xlu0 %v1347_v11  ;;  %v1338_v23 = vadd.f32 %v2547_v41, %v2542_v10  ;;  %1684 = vmatmul.mubr.msk.f32.gmra.mxu0 %vm336_vm0, %v493_v62  ;;  %v2560_v13 = vpop.eup %1796 }
 0x321   : > { %v1194_v22 = vmul.f32 1.442695, %v1120_v21  ;;  %v1196_v25 = vmul.f32 1.442695, %v1121_v30  ;;  %v2565_v18 = vpop.eup %1798  ;;  %v1202_v11 = vmul.f32 1.442695, %v1124_v63 }
 0x322   : > { %v1028_v5 = vpop.xlane.xlu0 %1027  ;;  %v1204_v30 = vmul.f32 1.442695, %v1125_v7  ;;  %v1335_v8 = vadd.f32 %v2565_v18, %v2560_v13  ;;  %v1200_v1 = vmul.f32 1.442695, %v1123_v14 }
 0x323   : > { %1804 = vpow2.f32 %v1194_v22  ;;  %v1198_v22 = vmul.f32 1.442695, %v1122_v19  ;;  %v1119_v2 = vsub.f32 %v2338_v61, %v1028_v5 }
 0x324   : > { %1806 = vpow2.f32 %v1196_v25  ;;  %1339 = vadd.xlane.f32.xlu0 %v1338_v23  ;;  %v1074_v25 = vmax.f32 %v2422_v40, %v2426_v42 }
 0x325   : > { %1808 = vpow2.f32 %v1210_v15  ;;  %v1192_v7 = vmul.f32 1.442695, %v1119_v2 }
 0x326   : > { %1810 = vpow2.f32 %v1212_v9  ;;  %v1025_v31 = vpop.xlane.xlu0 %1024 }
 0x327   : > { %v1116_v36 = vsub.f32 %v2332_v58, %v1025_v31  ;;  %v1117_v3 = vsub.f32 %v2334_v59, %v1025_v31  ;;  %1812 = vpow2.f32 %v1206_v6  ;;  %v2573_v58 = vpop.eup %1800  ;;  %v1118_v59 = vsub.f32 %v2336_v60, %v1028_v5 }
 0x328   : > { %1078 = vmax.xlane.f32.xlu0 %v1077_v17  ;;  %1814 = vpow2.f32 %v1208_v50  ;;  %v2579_v48 = vpop.eup %1802 }
 0x329   : > { %v1186_v4 = vmul.f32 1.442695, %v1116_v36  ;;  %v1188_v21 = vmul.f32 1.442695, %v1117_v3  ;;  %v1190_v60 = vmul.f32 1.442695, %v1118_v59 }
 0x32a   : > { %v1022_v15 = vpop.xlane.xlu0 %1021 }
 0x32b   : > { %1816 = vpow2.f32 %v1186_v4  ;;  %v1114_v61 = vsub.f32 %v2328_v56, %v1022_v15  ;;  %v1115_v50 = vsub.f32 %v2330_v57, %v1022_v15 }
 0x32c   : > { %1818 = vpow2.f32 %v1188_v21  ;;  %1336 = vadd.xlane.f32.xlu0 %v1335_v8 }
 0x32d   : > { %1820 = vpow2.f32 %v1202_v11  ;;  %v1182_v56 = vmul.f32 1.442695, %v1114_v61  ;;  %v1184_v57 = vmul.f32 1.442695, %v1115_v50 }
 0x32e   : > { %1822 = vpow2.f32 %v1204_v30  ;;  %v1019_v32 = vpop.xlane.xlu0 %1018 }
 0x32f   : > { %1824 = vpow2.f32 %v1198_v22  ;;  %v1112_v9 = vsub.f32 %v2324_v54, %v1019_v32  ;;  %v1113_v16 = vsub.f32 %v2326_v55, %v1019_v32  ;;  %v1332_v55 = vadd.f32 %v2579_v48, %v2573_v58 }
 0x330   : > { %v2583_v23 = vpop.eup %1804  ;;  %1826 = vpow2.f32 %v1200_v1  ;;  %1075 = vmax.xlane.f32.xlu0 %v1074_v25 }
 0x331   : > { %v2585_v62 = vpop.eup %1806  ;;  %v1178_v5 = vmul.f32 1.442695, %v1112_v9  ;;  %v1180_v63 = vmul.f32 1.442695, %v1113_v16 }
 0x332   : > { %v2588_v6 = vpop.eup %1808  ;;  %v1016_v31 = vpop.xlane.xlu0 %1015  ;;  %v1317_v54 = vadd.f32 %v2585_v62, %v2583_v23 }
 0x333   : > { %v2595_v17 = vpop.eup %1810  ;;  %1828 = vpow2.f32 %v1178_v5  ;;  %v1110_v19 = vsub.f32 %v2320_v52, %v1016_v31  ;;  %v1111_v3 = vsub.f32 %v2322_v53, %v1016_v31 }
 0x334   : > { %1830 = vpow2.f32 %v1180_v63  ;;  %1318 = vadd.xlane.f32.xlu1 %v1317_v54  ;;  %1333 = vadd.xlane.f32.xlu0 %v1332_v55  ;;  %v2598_v36 = vpop.eup %1812  ;;  %v1329_v11 = vadd.f32 %v2595_v17, %v2588_v6 }
 0x335   : > { %1832 = vpow2.f32 %v1190_v60  ;;  %v2603_v4 = vpop.eup %1814  ;;  %v1174_v15 = vmul.f32 1.442695, %v1110_v19  ;;  %v1176_v8 = vmul.f32 1.442695, %v1111_v3 }
 0x336   : > { %1834 = vpow2.f32 %v1192_v7  ;;  %v1094_v14 = vpop.xlane.xlu0 %1093  ;;  %v1326_v1 = vadd.f32 %v2603_v4, %v2598_v36 }
 0x337   : > { %1836 = vpow2.f32 %v1182_v56  ;;  %v1162_v60 = vsub.f32 %v2464_v38, %v1094_v14  ;;  %v1163_v63 = vsub.f32 %v2466_v39, %v1094_v14 }
 0x338   : > { %v2605_v21 = vpop.eup %1816  ;;  %1330 = vadd.xlane.f32.xlu0 %v1329_v11  ;;  %1838 = vpow2.f32 %v1184_v57 }
 0x339   : > { %v2607_v30 = vpop.eup %1818  ;;  %1840 = vpow2.f32 %v1174_v15  ;;  %v1278_v55 = vmul.f32 1.442695, %v1162_v60  ;;  %v1280_v19 = vmul.f32 1.442695, %v1163_v63 }
 0x33a   : > { %v2609_v52 = vpop.eup %1820  ;;  %v2611_v22 = vpop.xlane.xlu0 %1096  ;;  %v1311_v53 = vadd.f32 %v2607_v30, %v2605_v21  ;;  %1842 = vpow2.f32 %v1176_v8 }
 0x33b   : > { %v2617_v59 = vpop.eup %1822  ;;  %1844 = vpow2.f32 %v1278_v55 }
 0x33c   : > { %v2619_v2 = vpop.eup %1824  ;;  %1312 = vadd.xlane.f32.xlu1 %v1311_v53  ;;  %1327 = vadd.xlane.f32.xlu0 %v1326_v1  ;;  %v1323_v9 = vadd.f32 %v2617_v59, %v2609_v52  ;;  %1846 = vpow2.f32 %v1280_v19 }
 0x33d   : > { %v2621_v32 = vpop.eup %1826 }
 0x33e   : > { %v1100_v25 = vpop.xlane.xlu0 %1099  ;;  %v1320_v31 = vadd.f32 %v2621_v32, %v2619_v2 }
 0x33f   : > { %v1166_v38 = vsub.f32 %v2476_v49, %v1100_v25  ;;  %v1167_v57 = vsub.f32 %v2478_v51, %v1100_v25 }
 0x340   : > { %v2625_v16 = vpop.eup %1828  ;;  %1324 = vadd.xlane.f32.xlu0 %v1323_v9 }
 0x341   : > { %v2628_v61 = vpop.eup %1830  ;;  %v1286_v8 = vmul.f32 1.442695, %v1166_v38  ;;  %v1288_v51 = vmul.f32 1.442695, %v1167_v57 }
 0x342   : > { %v2630_v5 = vpop.eup %1832  ;;  %v1103_v7 = vpop.xlane.xlu0 %1102  ;;  %v1305_v50 = vadd.f32 %v2628_v61, %v2625_v16 }
 0x343   : > { %v2637_v54 = vpop.eup %1834  ;;  %v1168_v49 = vsub.f32 %v2482_v26, %v1103_v7  ;;  %v1169_v25 = vsub.f32 %v2484_v35, %v1103_v7  ;;  %v1164_v26 = vsub.f32 %v2470_v43, %v2611_v22  ;;  %v1165_v7 = vsub.f32 %v2472_v45, %v2611_v22  ;;  %v2970_v22 = vld [vmem:[#allocation22_spill] sm:$0xff] }
 0x344   : > { %1306 = vadd.xlane.f32.xlu1 %v1305_v50  ;;  %1321 = vadd.xlane.f32.xlu0 %v1320_v31  ;;  %v2640_v56 = vpop.eup %1836  ;;  %v1314_v3 = vadd.f32 %v2637_v54, %v2630_v5 }
 0x345   : > { %v2645_v14 = vpop.eup %1838  ;;  %v1290_v31 = vmul.f32 1.442695, %v1168_v49  ;;  %v1292_v38 = vmul.f32 1.442695, %v1169_v25  ;;  %v1284_v57 = vmul.f32 1.442695, %v1165_v7 }
 0x346   : > { %v1106_v39 = vpop.xlane.xlu0 %1105  ;;  %v2650_v9 = vpop.eup %1840  ;;  %v1308_v63 = vadd.f32 %v2645_v14, %v2640_v56 }
 0x347   : > { %v1170_v11 = vsub.f32 %v2488_v0, %v1106_v39  ;;  %v1171_v15 = vsub.f32 %v2490_v28, %v1106_v39  ;;  %v2655_v0 = vpop.eup %1842  ;;  %v2968_v39 = vld [vmem:[#allocation23_spill] sm:$0xff] }
 0x348   : > { %1315 = vadd.xlane.f32.xlu0 %v1314_v3  ;;  %v2669_v49 = vpop.eup %1844 }
 0x349   : > { %v1294_v53 = vmul.f32 1.442695, %v1170_v11  ;;  %v1296_v1 = vmul.f32 1.442695, %v1171_v15  ;;  %v2969_v15 = vld [vmem:[#allocation21_spill] sm:$0xff]  ;;  %2971 = vst [vmem:[#allocation23_spill] sm:$0xff] %v2669_v49 }
 0x34a   : > { %v1109_v60 = vpop.xlane.xlu0 %1108 }
 0x34b   : > { %1848 = vpow2.f32 %v1294_v53  ;;  %v1172_v28 = vsub.f32 %v2494_v27, %v1109_v60  ;;  %v1173_v50 = vsub.f32 %v2496_v34, %v1109_v60  ;;  %v1302_v27 = vadd.f32 %v2655_v0, %v2650_v9 }
 0x34c   : > { %1850 = vpow2.f32 %v1296_v1  ;;  %1309 = vadd.xlane.f32.xlu0 %v1308_v63  ;;  %v1282_v34 = vmul.f32 1.442695, %v1164_v26  ;;  %v2671_v63 = vpop.eup %1846 }
 0x34d   : > { %1852 = vpow2.f32 %v1286_v8  ;;  %v1298_v55 = vmul.f32 1.442695, %v1172_v28  ;;  %v1300_v35 = vmul.f32 1.442695, %v1173_v50  ;;  %2972 = vst [vmem:[#allocation21_spill] sm:$0xff] %v2671_v63  ;;  %v2974_v50 = vld [vmem:[#allocation20_spill] sm:$0xff] }
 0x34e   : > { %1854 = vpow2.f32 %v1288_v51  ;;  %v1091_v19 = vpop.xlane.xlu0 %1090 }
 0x34f   : > { %1856 = vpow2.f32 %v1298_v55  ;;  %v1160_v43 = vsub.f32 %v2458_v29, %v1091_v19  ;;  %v1161_v3 = vsub.f32 %v2968_v39, %v1091_v19  ;;  %v2973_v29 = vld [vmem:[#allocation19_spill] sm:$0xff]  ;;  %v2977_v39 = vld [vmem:[#allocation18_spill] sm:$0xff] }
 0x350   : > { %1858 = vpow2.f32 %v1300_v35  ;;  %1303 = vadd.xlane.f32.xlu0 %v1302_v27 }
 0x351   : > { %1860 = vpow2.f32 %v1290_v31  ;;  %v1274_v53 = vmul.f32 1.442695, %v1160_v43  ;;  %v1276_v25 = vmul.f32 1.442695, %v1161_v3  ;;  %v2976_v43 = vld [vmem:[#allocation17_spill] sm:$0xff] }
 0x352   : > { %1862 = vpow2.f32 %v1292_v38  ;;  %v1088_v11 = vpop.xlane.xlu0 %1087 }
 0x353   : > { %v1158_v45 = vsub.f32 %v2969_v15, %v1088_v11  ;;  %v1159_v8 = vsub.f32 %v2970_v22, %v1088_v11  ;;  %1864 = vpow2.f32 %v1282_v34 }
 0x354   : > { %1866 = vpow2.f32 %v1284_v57 }
 0x355   : > { %v1270_v1 = vmul.f32 1.442695, %v1158_v45  ;;  %v1272_v51 = vmul.f32 1.442695, %v1159_v8 }
 0x356   : > { %v1085_v60 = vpop.xlane.xlu0 %1084 }
 0x357   : > { %1868 = vpow2.f32 %v1270_v1  ;;  %v1156_v28 = vsub.f32 %v2973_v29, %v1085_v60  ;;  %v1157_v26 = vsub.f32 %v2974_v50, %v1085_v60  ;;  %v1380_v29 = vadd.f32 %v2671_v63, %v2669_v49 }
 0x358   : > { %v2675_v31 = vpop.eup %1848  ;;  %1870 = vpow2.f32 %v1272_v51 }
 0x359   : > { %v2677_v55 = vpop.eup %1850  ;;  %1872 = vpow2.f32 %v1274_v53  ;;  %v1266_v35 = vmul.f32 1.442695, %v1156_v28  ;;  %v1268_v38 = vmul.f32 1.442695, %v1157_v26 }
 0x35a   : > { %v2679_v7 = vpop.eup %1852  ;;  %1874 = vpow2.f32 %v1276_v25  ;;  %v1082_v19 = vpop.xlane.xlu0 %1081  ;;  %v1392_v27 = vadd.f32 %v2677_v55, %v2675_v31 }
 0x35b   : > { %2975 = vst [vmem:[#allocation22_spill] sm:$0xff] %v2679_v7  ;;  %v2683_v34 = vpop.eup %1854  ;;  %v1154_v57 = vsub.f32 %v2976_v43, %v1082_v19  ;;  %v1155_v3 = vsub.f32 %v2977_v39, %v1082_v19  ;;  %1876 = vpow2.f32 %v1266_v35 }
 0x35c   : > { %v2687_v11 = vpop.eup %1856  ;;  %1393 = vadd.xlane.f32.xlu0 %v1392_v27  ;;  %1878 = vpow2.f32 %v1268_v38  ;;  %v1386_v1 = vadd.f32 %v2683_v34, %v2679_v7 }
 0x35d   : > { %v2689_v15 = vpop.eup %1858  ;;  %v1262_v45 = vmul.f32 1.442695, %v1154_v57  ;;  %v1264_v22 = vmul.f32 1.442695, %v1155_v3 }
 0x35e   : > { %v2691_v8 = vpop.eup %1860  ;;  %v1395_v53 = vadd.f32 %v2689_v15, %v2687_v11 }
 0x35f   : > { %v2697_v51 = vpop.eup %1862  ;;  %1880 = vpow2.f32 %v1262_v45 }
 0x360   : > { %1882 = vpow2.f32 %v1264_v22  ;;  %1396 = vadd.xlane.f32.xlu1 %v1395_v53  ;;  %1387 = vadd.xlane.f32.xlu0 %v1386_v1  ;;  %v2699_v25 = vpop.eup %1864  ;;  %v1389_v60 = vadd.f32 %v2697_v51, %v2691_v8 }
 0x361   : > { %2978 = vst [vmem:[#allocation19_spill] sm:$0xff] %v2699_v25  ;;  %v2705_v28 = vpop.eup %1866 }
 0x362   : > { %2979 = vst [vmem:[#allocation20_spill] sm:$0xff] %v2705_v28  ;;  %v1383_v38 = vadd.f32 %v2705_v28, %v2699_v25  ;;  %v2992_v28 = vld [vmem:[#allocation12_spill] sm:$0xff] }
 0x364   : > { %v2707_v50 = vpop.eup %1868  ;;  %1390 = vadd.xlane.f32.xlu1 %v1389_v60  ;;  %1381 = vadd.xlane.f32.xlu0 %v1380_v29  ;;  %v1073_v60 = vpop.xlane.xlu1 %1072 }
 0x365   : > { %2980 = vst [vmem:[#allocation17_spill] sm:$0xff] %v2707_v50  ;;  %v2709_v26 = vpop.eup %1870 }
 0x366   : > { %2981 = vst [vmem:[#allocation18_spill] sm:$0xff] %v2709_v26  ;;  %v2711_v35 = vpop.eup %1872  ;;  %v1374_v19 = vadd.f32 %v2709_v26, %v2707_v50  ;;  %v2988_v50 = vld [vmem:[#allocation15_spill] sm:$0xff] }
 0x367   : > { %2982 = vst [vmem:[#allocation24_spill] sm:$0xff] %v2711_v35  ;;  %v2717_v27 = vpop.eup %1874  ;;  %v1148_v26 = vsub.f32 %v2988_v50, %v1073_v60 }
 0x368   : > { %2983 = vst [vmem:[#allocation25_spill] sm:$0xff] %v2717_v27  ;;  %1384 = vadd.xlane.f32.xlu1 %v1383_v38  ;;  %1375 = vadd.xlane.f32.xlu0 %v1374_v19  ;;  %v2719_v43 = vpop.eup %1876  ;;  %v1377_v57 = vadd.f32 %v2717_v27, %v2711_v35  ;;  %v1070_v19 = vpop.xlane.xlu1 %1069  ;;  %v2989_v35 = vld [vmem:[#allocation16_spill] sm:$0xff] }
 0x369   : > { %2984 = vst [vmem:[#allocation26_spill] sm:$0xff] %v2719_v43  ;;  %v2723_v39 = vpop.eup %1878  ;;  %v1149_v27 = vsub.f32 %v2989_v35, %v1073_v60  ;;  %v1250_v49 = vmul.f32 1.442695, %v1148_v26 }
 0x36a   : > { %2985 = vst [vmem:[#allocation27_spill] sm:$0xff] %v2723_v39  ;;  %v1371_v22 = vadd.f32 %v2723_v39, %v2719_v43 }
 0x36b   : > { %v1252_v50 = vmul.f32 1.442695, %v1149_v27 }
 0x36c   : > { %v2725_v3 = vpop.eup %1880  ;;  %1378 = vadd.xlane.f32.xlu1 %v1377_v57  ;;  %v1067_v43 = vpop.xlane.xlu1 %1066 }
 0x36d   : > { %2986 = vst [vmem:[#allocation28_spill] sm:$0xff] %v2725_v3  ;;  %v2727_v45 = vpop.eup %1882 }
 0x36e   : > { %2987 = vst [vmem:[#allocation29_spill] sm:$0xff] %v2727_v45  ;;  %v1368_v53 = vadd.f32 %v2727_v45, %v2725_v3  ;;  %v2990_v3 = vld [vmem:[#allocation13_spill] sm:$0xff] }
 0x36f   : > { %v1146_v45 = vsub.f32 %v2990_v3, %v1070_v19 }
 0x370   : > { %1372 = vadd.xlane.f32.xlu1 %v1371_v22  ;;  %1369 = vadd.xlane.f32.xlu0 %v1368_v53 }
 0x371   : > { %v1246_v60 = vmul.f32 1.442695, %v1146_v45 }
 0x3a1   : > { %v1343_v1 = vpop.xlane.xlu0 %1342 }
 0x3a5   : > { %v1346_v29 = vpop.xlane.xlu0 %1345 }
 0x3a6   : > { %1884 = vrcp.f32 %v1346_v29  ;;  %v2991_v29 = vld [vmem:[#allocation11_spill] sm:$0xff] }
 0x3a7   : > { %v1144_v63 = vsub.f32 %v2991_v29, %v1067_v43 }
 0x3a9   : > { %v1349_v38 = vpop.xlane.xlu0 %1348 }
 0x3aa   : > { %1886 = vrcp.f32 %v1349_v38 }
 0x3ab   : > { %1888 = vrcp.f32 %v1343_v1  ;;  %v1145_v1 = vsub.f32 %v2992_v28, %v1067_v43 }
 0x3ad   : > { %v1340_v57 = vpop.xlane.xlu0 %1339 }
 0x3ae   : > { %1890 = vrcp.f32 %v1340_v57  ;;  %v1242_v57 = vmul.f32 1.442695, %v1144_v63 }
 0x3af   : > { %1892 = vpow2.f32 %v1250_v49  ;;  %v1064_v49 = vpop.xlane.xlu1 %1063 }
 0x3b1   : > { %v1079_v39 = vpop.xlane.xlu0 %1078 }
 0x3b2   : > { %v1152_v22 = vsub.f32 %v2430_v44, %v1079_v39  ;;  %v1153_v53 = vsub.f32 %v2434_v46, %v1079_v39  ;;  %v2993_v39 = vld [vmem:[#allocation14_spill] sm:$0xff] }
 0x3b3   : > { %v1885_v35 = vpop.eup %1884  ;;  %v1147_v3 = vsub.f32 %v2993_v39, %v1070_v19 }
 0x3b4   : > { %v1258_v38 = vmul.f32 1.442695, %v1152_v22  ;;  %v1260_v25 = vmul.f32 1.442695, %v1153_v53  ;;  %v1244_v22 = vmul.f32 1.442695, %v1145_v1  ;;  %v1459_v45 = vmul.f32 %v1885_v35, %v2532_v12 }
 0x3b5   : > { %v1337_v7 = vpop.xlane.xlu0 %1336  ;;  %v1248_v19 = vmul.f32 1.442695, %v1147_v3  ;;  %v2995_v53 = vld [vmem:[#allocation10_spill] sm:$0xff] }
 0x3b6   : > { %1894 = vpow2.f32 %v1258_v38  ;;  %v1143_v29 = vsub.f32 %v2995_v53, %v1064_v49 }
 0x3b7   : > { %v1887_v26 = vpop.eup %1886  ;;  %1896 = vpow2.f32 %v1260_v25 }
 0x3b8   : > { %1898 = vrcp.f32 %v1337_v7  ;;  %v1461_v44 = vmul.f32 %v1887_v26, %v2539_v33  ;;  %v1460_v46 = vmul.f32 %v1887_v26, %v2537_v47  ;;  %v1889_v25 = vpop.eup %1888  ;;  %v2994_v33 = vld [vmem:[#allocation9_spill] sm:$0xff]  ;;  %v1240_v1 = vmul.f32 1.442695, %v1143_v29 }
 0x3b9   : > { %1900 = vpow2.f32 %v1252_v50  ;;  %v1076_v27 = vpop.xlane.xlu0 %1075  ;;  %v1142_v63 = vsub.f32 %v2994_v33, %v1064_v49 }
 0x3ba   : > { %v1150_v28 = vsub.f32 %v2422_v40, %v1076_v27  ;;  %v1151_v43 = vsub.f32 %v2426_v42, %v1076_v27  ;;  %1494 = vmatprep.subr.mxu0 %v1461_v44  ;;  %1902 = vpow2.f32 %v1246_v60  ;;  %v1458_v40 = vmul.f32 %v1885_v35, %v2529_v20 }
 0x3bb   : > { %1495 = vmatpush1.xpose.msra.mxu0 %v1460_v46  ;;  %1904 = vpow2.f32 %v1242_v57  ;;  %v1457_v42 = vmul.f32 %v1889_v25, %v2525_v24  ;;  %v1891_v12 = vpop.eup %1890  ;;  %v1238_v50 = vmul.f32 1.442695, %v1142_v63  ;;  %v1456_v60 = vmul.f32 %v1889_v25, %v2523_v37 }
 0x3bc   : > { %v1254_v47 = vmul.f32 1.442695, %v1150_v28  ;;  %v1256_v7 = vmul.f32 1.442695, %v1151_v43  ;;  %1496 = vmatprep.subr.mxu0 %v1459_v45  ;;  %1906 = vpow2.f32 %v1244_v22  ;;  %v2751_v57 = vpop.eup %1892  ;;  %v1455_v44 = vmul.f32 %v1891_v12, %v2547_v41 }
 0x3bd   : > { %v1334_v38 = vpop.xlane.xlu0 %1333  ;;  %v1454_v37 = vmul.f32 %v1891_v12, %v2542_v10  ;;  %v1319_v33 = vpop.xlane.xlu1 %1318 }
 0x3be   : > { %1908 = vpow2.f32 %v1254_v47 }
 0x3bf   : > { %1910 = vpow2.f32 %v1256_v7  ;;  %1497 = vmatpush1.xpose.msra.mxu0 %v1458_v40 }
 0x3c0   : > { %1912 = vrcp.f32 %v1334_v38  ;;  %1498 = vmatprep.subr.mxu0 %v1457_v42 }
 0x3c1   : > { %1914 = vpow2.f32 %v1248_v19  ;;  %v1331_v26 = vpop.xlane.xlu0 %1330 }
 0x3c2   : > { %1916 = vrcp.f32 %v1331_v26 }
 0x3c3   : > { %v2754_v20 = vpop.eup %1894  ;;  %1499 = vmatpush1.xpose.msra.mxu0 %v1456_v60  ;;  %1918 = vpow2.f32 %v1238_v50 }
 0x3c4   : > { %v2756_v24 = vpop.eup %1896  ;;  %1500 = vmatprep.subr.mxu0 %v1455_v44  ;;  %1920 = vpow2.f32 %v1240_v1 }
 0x3c5   : > { %v1899_v35 = vpop.eup %1898  ;;  %v1328_v46 = vpop.xlane.xlu0 %1327  ;;  %v1365_v39 = vadd.f32 %v2756_v24, %v2754_v20 }
 0x3c6   : > { %v2761_v3 = vpop.eup %1900  ;;  %1922 = vrcp.f32 %v1328_v46  ;;  %v1453_v41 = vmul.f32 %v1899_v35, %v2565_v18  ;;  %v1452_v43 = vmul.f32 %v1899_v35, %v2560_v13  ;;  %v1313_v26 = vpop.xlane.xlu1 %1312 }
 0x3c7   : > { %1366 = vadd.xlane.f32.xlu1 %v1365_v39  ;;  %1501 = vmatpush1.xpose.msra.mxu0 %v1454_v37  ;;  %v2764_v22 = vpop.eup %1902  ;;  %v1359_v28 = vadd.f32 %v2761_v3, %v2751_v57 }
 0x3c8   : > { %1502 = vmatprep.subr.mxu0 %v1453_v41  ;;  %v2766_v49 = vpop.eup %1904 }
 0x3c9   : > { %v1325_v27 = vpop.xlane.xlu0 %1324  ;;  %v2771_v45 = vpop.eup %1906 }
 0x3ca   : > { %1924 = vrcp.f32 %v1325_v27  ;;  %v1353_v7 = vadd.f32 %v2771_v45, %v2766_v49  ;;  %v494_v27 = vld [vmem:[%s2912_s6] sm:$0xff] }
 0x3cb   : > { %v2773_v10 = vpop.eup %1908  ;;  %1360 = vadd.xlane.f32.xlu1 %v1359_v28  ;;  %1503 = vmatpush1.xpose.msra.mxu0 %v1452_v43 }
 0x3cc   : > { %v2775_v18 = vpop.eup %1910 }
 0x3cd   : > { %v1913_v25 = vpop.eup %1912  ;;  %v1322_v63 = vpop.xlane.xlu0 %1321  ;;  %v1362_v47 = vadd.f32 %v2775_v18, %v2773_v10 }
 0x3ce   : > { %v2781_v19 = vpop.eup %1914  ;;  %1926 = vrcp.f32 %v1322_v63  ;;  %v1451_v13 = vmul.f32 %v1913_v25, %v2579_v48  ;;  %v1450_v53 = vmul.f32 %v1913_v25, %v2573_v58  ;;  %v1307_v41 = vpop.xlane.xlu1 %1306 }
 0x3cf   : > { %v1917_v29 = vpop.eup %1916  ;;  %1363 = vadd.xlane.f32.xlu0 %v1362_v47  ;;  %1354 = vadd.xlane.f32.xlu1 %v1353_v7  ;;  %1928 = vrcp.f32 %v1319_v33  ;;  %v1356_v12 = vadd.f32 %v2781_v19, %v2764_v22  ;;  %v495_v7 = vld [vmem:[%s2912_s6 + $0x8] sm:$0xff] }
 0x3d0   : > { %1504 = vmatprep.subr.mxu0 %v1451_v13  ;;  %v1449_v38 = vmul.f32 %v1917_v29, %v2595_v17  ;;  %v2786_v40 = vpop.eup %1918  ;;  %v1448_v50 = vmul.f32 %v1917_v29, %v2588_v6 }
 0x3d1   : > { %1505 = vmatpush1.xpose.msra.mxu0 %v1450_v53  ;;  %v1316_v42 = vpop.xlane.xlu0 %1315  ;;  %v2791_v1 = vpop.eup %1920 }
 0x3d2   : > { %1506 = vmatprep.subr.mxu0 %v1449_v38  ;;  %1930 = vrcp.f32 %v1316_v42  ;;  %v1350_v17 = vadd.f32 %v2791_v1, %v2786_v40 }
 0x3d3   : > { %v1923_v58 = vpop.eup %1922  ;;  %1357 = vadd.xlane.f32.xlu0 %v1356_v12  ;;  %1932 = vrcp.f32 %v1313_v26 }
 0x3d4   : > { %v1447_v48 = vmul.f32 %v1923_v58, %v2603_v4  ;;  %v1446_v60 = vmul.f32 %v1923_v58, %v2598_v36 }
 0x3d5   : > { %1507 = vmatpush1.xpose.msra.mxu0 %v1448_v50  ;;  %v1310_v35 = vpop.xlane.xlu0 %1309 }
 0x3d6   : > { %1508 = vmatprep.subr.mxu0 %v1447_v48  ;;  %1934 = vrcp.f32 %v1310_v35  ;;  %v2996_v35 = vld [vmem:[#allocation22_spill] sm:$0xff] }
 0x3d7   : > { %v1925_v44 = vpop.eup %1924  ;;  %1351 = vadd.xlane.f32.xlu0 %v1350_v17  ;;  %1936 = vrcp.f32 %v1307_v41 }
 0x3d8   : > { %v1445_v6 = vmul.f32 %v1925_v44, %v2617_v59  ;;  %v1444_v46 = vmul.f32 %v1925_v44, %v2609_v52 }
 0x3d9   : > { %1509 = vmatpush1.xpose.msra.mxu0 %v1446_v60  ;;  %v1304_v28 = vpop.xlane.xlu0 %1303 }
 0x3da   : > { %1510 = vmatprep.subr.mxu0 %v1445_v6  ;;  %1938 = vrcp.f32 %v1304_v28 }
 0x3db   : > { %v1927_v39 = vpop.eup %1926 }
 0x3dc   : > { %v1443_v4 = vmul.f32 %v1927_v39, %v2621_v32  ;;  %v1929_v37 = vpop.eup %1928  ;;  %v1442_v36 = vmul.f32 %v1927_v39, %v2619_v2 }
 0x3dd   : > { %1511 = vmatpush1.xpose.msra.mxu0 %v1444_v46  ;;  %v1441_v59 = vmul.f32 %v1929_v37, %v2585_v62  ;;  %v1440_v32 = vmul.f32 %v1929_v37, %v2583_v23  ;;  %v2998_v37 = vld [vmem:[#allocation19_spill] sm:$0xff] }
 0x3de   : > { %1512 = vmatprep.subr.mxu0 %v1443_v4 }
 0x3df   : > { %v1931_v52 = vpop.eup %1930 }
 0x3e0   : > { %498 = vperm.xlu1 %1779, %v494_v27   ;;  %v1439_v43 = vmul.f32 %v1931_v52, %v2637_v54  ;;  %v1933_v25 = vpop.eup %1932  ;;  %v1438_v2 = vmul.f32 %v1931_v52, %v2630_v5  ;;  %v3001_v52 = vld [vmem:[#allocation25_spill] sm:$0xff] }
 0x3e1   : > { %1513 = vmatpush1.xpose.msra.mxu0 %v1442_v36  ;;  %v1437_v33 = vmul.f32 %v1933_v25, %v2607_v30  ;;  %v1436_v23 = vmul.f32 %v1933_v25, %v2605_v21 }
 0x3e2   : > { %1514 = vmatprep.subr.mxu0 %v1441_v59 }
 0x3e3   : > { %v1935_v63 = vpop.eup %1934 }
 0x3e4   : > { %v1435_v54 = vmul.f32 %v1935_v63, %v2645_v14  ;;  %v1937_v13 = vpop.eup %1936  ;;  %v1434_v30 = vmul.f32 %v1935_v63, %v2640_v56 }
 0x3e5   : > { %1515 = vmatpush1.xpose.msra.mxu0 %v1440_v32  ;;  %v1394_v47 = vpop.xlane.xlu0 %1393  ;;  %v1433_v53 = vmul.f32 %v1937_v13, %v2628_v61  ;;  %v1432_v42 = vmul.f32 %v1937_v13, %v2625_v16  ;;  %v3006_v13 = vld [vmem:[#allocation26_spill] sm:$0xff] }
 0x3e6   : > { %1516 = vmatprep.subr.mxu0 %v1439_v43  ;;  %v3002_v43 = vld [vmem:[#allocation24_spill] sm:$0xff] }
 0x3e7   : > { %v1939_v29 = vpop.eup %1938 }
 0x3e8   : > { %v1431_v21 = vmul.f32 %v1939_v29, %v2655_v0  ;;  %v1430_v12 = vmul.f32 %v1939_v29, %v2650_v9  ;;  %v3008_v29 = vld [vmem:[#allocation28_spill] sm:$0xff] }
 0x3e9   : > { %1517 = vmatpush1.xpose.msra.mxu0 %v1438_v2  ;;  %v1397_v62 = vpop.xlane.xlu1 %1396  ;;  %v1388_v38 = vpop.xlane.xlu0 %1387  ;;  %v3003_v2 = vld [vmem:[#allocation18_spill] sm:$0xff] }
 0x3ea   : > { %1518 = vmatprep.subr.mxu0 %v1437_v33  ;;  %1940 = vrcp.f32 %v1397_v62 }
 0x3eb   : > { %1942 = vrcp.f32 %v1394_v47  ;;  %v3004_v47 = vld [vmem:[#allocation17_spill] sm:$0xff] }
 0x3ed   : > { %1519 = vmatpush1.xpose.msra.mxu0 %v1436_v23  ;;  %503 = vperm.xlu0 %1778, %v495_v7   ;;  %v1391_v5 = vpop.xlane.xlu1 %1390  ;;  %v1382_v58 = vpop.xlane.xlu0 %1381  ;;  %v3005_v7 = vld [vmem:[#allocation27_spill] sm:$0xff] }
 0x3ee   : > { %1520 = vmatprep.subr.mxu0 %v1435_v54  ;;  %1944 = vrcp.f32 %v1391_v5 }
 0x3ef   : > { %1946 = vrcp.f32 %v1388_v38 }
 0x3f1   : > { %1521 = vmatpush1.xpose.msra.mxu0 %v1434_v30  ;;  %v1385_v14 = vpop.xlane.xlu1 %1384  ;;  %v1376_v44 = vpop.xlane.xlu0 %1375  ;;  %v3007_v30 = vld [vmem:[#allocation29_spill] sm:$0xff] }
 0x3f2   : > { %1522 = vmatprep.subr.mxu0 %v1433_v53  ;;  %1948 = vrcp.f32 %v1385_v14  ;;  %v578_v14 = vpop.f32.mrf.mxu0 }
 0x3f3   : > { %1950 = vrcp.f32 %v1382_v58 }
 0x3f5   : > { %1523 = vmatpush1.xpose.msra.mxu0 %v1432_v42  ;;  %v1379_v0 = vpop.xlane.xlu1 %1378 }
 0x3f6   : > { %1524 = vmatprep.subr.mxu0 %v1431_v21  ;;  %1952 = vrcp.f32 %v1379_v0 }
 0x3f7   : > { %v1941_v50 = vpop.eup %1940  ;;  %1954 = vrcp.f32 %v1376_v44 }
 0x3f8   : > { %v1943_v56 = vpop.eup %1942  ;;  %v1493_v61 = vmul.f32 %v1941_v50, %v2689_v15  ;;  %v1492_v48 = vmul.f32 %v1941_v50, %v2687_v11 }
 0x3f9   : > { %1525 = vmatpush1.xpose.msra.mxu0 %v1430_v12  ;;  %v1491_v16 = vmul.f32 %v1943_v56, %v2677_v55  ;;  %v1490_v17 = vmul.f32 %v1943_v56, %v2675_v31  ;;  %v1373_v55 = vpop.xlane.xlu1 %1372  ;;  %v2997_v31 = vld [vmem:[#allocation20_spill] sm:$0xff]  ;;  %v580_v56 = vpop.f32.mrf.mxu0 }
 0x3fa   : > { %1526 = vmatprep.subr.mxu0 %v1493_v61  ;;  %1956 = vrcp.f32 %v1373_v55 }
 0x3fb   : > { %v1945_v26 = vpop.eup %1944 }
 0x3fc   : > { %v1489_v9 = vmul.f32 %v1945_v26, %v2697_v51  ;;  %v1947_v60 = vpop.eup %1946  ;;  %v1488_v15 = vmul.f32 %v1945_v26, %v2691_v8  ;;  %v1370_v51 = vpop.xlane.xlu0 %1369  ;;  %v2999_v8 = vld [vmem:[#allocation21_spill] sm:$0xff] }
 0x3fd   : > { %1527 = vmatpush2.xpose.msra.mxu0 %v1492_v48  ;;  %v1487_v11 = vmul.f32 %v1947_v60, %v2683_v34  ;;  %v1486_v46 = vmul.f32 %v1947_v60, %v2996_v35  ;;  %1958 = vrcp.f32 %v1370_v51  ;;  %v3000_v34 = vld [vmem:[#allocation23_spill] sm:$0xff] }
 0x3fe   : > { %1528 = vmatprep.subr.mxu0 %v1491_v16 }
 0x3ff   : > { %v1949_v6 = vpop.eup %1948 }
 0x400   : > { %v1485_v39 = vmul.f32 %v1949_v6, %v2997_v31  ;;  %v1951_v4 = vpop.eup %1950  ;;  %v1484_v41 = vmul.f32 %v1949_v6, %v2998_v37 }
 0x401   : > { %1529 = vmatpush2.xpose.msra.mxu0 %v1490_v17  ;;  %v1483_v36 = vmul.f32 %v1951_v4, %v2999_v8  ;;  %v1482_v59 = vmul.f32 %v1951_v4, %v3000_v34 }
 0x402   : > { %1530 = vmatprep.subr.mxu0 %v1489_v9 }
 0x403   : > { %v1953_v27 = vpop.eup %1952 }
 0x404   : > { %v1481_v28 = vmul.f32 %v1953_v27, %v3001_v52  ;;  %v1955_v32 = vpop.eup %1954  ;;  %v1480_v25 = vmul.f32 %v1953_v27, %v3002_v43  ;;  %v1973_v27 = vld [vmem:[%s2229_s20 + $0x8] sm:$0xff] }
 0x405   : > { %1531 = vmatpush2.xpose.msra.mxu0 %v1488_v15  ;;  %v1479_v33 = vmul.f32 %v1955_v32, %v3003_v2  ;;  %v1478_v62 = vmul.f32 %v1955_v32, %v3004_v47 }
 0x406   : > { %1532 = vmatprep.subr.mxu0 %v1487_v11 }
 0x407   : > { %v1957_v63 = vpop.eup %1956 }
 0x408   : > { %v1477_v23 = vmul.f32 %v1957_v63, %v3005_v7  ;;  %v1476_v5 = vmul.f32 %v1957_v63, %v3006_v13 }
 0x409   : > { %1533 = vmatpush2.xpose.msra.mxu0 %v1486_v46 }
 0x40a   : > { %1534 = vmatprep.subr.mxu0 %v1485_v39  ;;  %v1959_v54 = vpop.eup %1958 }
 0x40b   : > { %v1475_v53 = vmul.f32 %v1959_v54, %v3007_v30  ;;  %v1474_v38 = vmul.f32 %v1959_v54, %v3008_v29 }
 0x40d   : > { %1535 = vmatpush2.xpose.msra.mxu0 %v1484_v41  ;;  %v1972_v41 = vld [vmem:[%s2229_s20] sm:$0xff] }
 0x40e   : > { %1536 = vmatprep.subr.mxu0 %v1483_v36 }
 0x411   : > { %1537 = vmatpush2.xpose.msra.mxu0 %v1482_v59 }
 0x412   : > { %1538 = vmatprep.subr.mxu0 %v1481_v28  ;;  %v1974_v28 = vld [vmem:[%s2229_s20 + $0x10] sm:$0xff] }
 0x415   : > { %1539 = vmatpush2.xpose.msra.mxu0 %v1480_v25  ;;  %v1975_v25 = vld [vmem:[%s2229_s20 + $0x18] sm:$0xff] }
 0x416   : > { %1540 = vmatprep.subr.mxu0 %v1479_v33 }
 0x419   : > { %1541 = vmatpush2.xpose.msra.mxu0 %v1478_v62 }
 0x41a   : > { %1542 = vmatprep.subr.mxu0 %v1477_v23 }
 0x41d   : > { %1543 = vmatpush2.xpose.msra.mxu0 %v1476_v5 }
 0x41e   : > { %1544 = vmatprep.subr.mxu0 %v1475_v53 }
 0x421   : > { %1545 = vmatpush2.xpose.msra.mxu0 %v1474_v38 }
 0x450   : > { %v1367_v42 = vpop.xlane.xlu1 %1366 }
 0x451   : > { %1960 = vrcp.f32 %v1367_v42 }
 0x454   : > { %v1361_v21 = vpop.xlane.xlu1 %1360 }
 0x455   : > { %1962 = vrcp.f32 %v1361_v21 }
 0x458   : > { %v1364_v12 = vpop.xlane.xlu0 %1363  ;;  %v1355_v50 = vpop.xlane.xlu1 %1354 }
 0x459   : > { %1964 = vrcp.f32 %v1364_v12 }
 0x45c   : > { %v1358_v58 = vpop.xlane.xlu0 %1357  ;;  %v499_v61 = vpop.permute.xlu1 %498 }
 0x45d   : > { %1966 = vrcp.f32 %v1358_v58  ;;  %v581_v48 = vadd.f32 %v580_v56, %v499_v61 }
 0x45e   : > { %v1961_v16 = vpop.eup %1960  ;;  %1968 = vrcp.f32 %v1355_v50 }
 0x45f   : > { %v1473_v26 = vmul.f32 %v1961_v16, %v2756_v24  ;;  %v1472_v0 = vmul.f32 %v1961_v16, %v2754_v20  ;;  %1558 = vmatprep.mubr.f32.mxu0 %v581_v48 }
 0x460   : > { %v1352_v17 = vpop.xlane.xlu0 %1351 }
 0x461   : > { %1546 = vmatprep.subr.mxu0 %v1473_v26  ;;  %1970 = vrcp.f32 %v1352_v17 }
 0x462   : > { %1547 = vmatpush2.xpose.msra.mxu0 %v1472_v0  ;;  %v1963_v9 = vpop.eup %1962 }
 0x463   : > { %v1469_v11 = vmul.f32 %v1963_v9, %v2761_v3  ;;  %v1468_v20 = vmul.f32 %v1963_v9, %v2751_v57  ;;  %v584_v3 = vpop.f32.mrf.mxu0 }
 0x466   : > { %v1965_v60 = vpop.eup %1964 }
 0x467   : > { %v1471_v44 = vmul.f32 %v1965_v60, %v2775_v18  ;;  %v1470_v15 = vmul.f32 %v1965_v60, %v2773_v10 }
 0x468   : > { %v504_v39 = vpop.permute.xlu0 %503 }
 0x469   : > { %1548 = vmatprep.subr.mxu0 %v1471_v44 }
 0x46a   : > { %v1967_v6 = vpop.eup %1966  ;;  %1549 = vmatpush2.xpose.msra.mxu0 %v1470_v15 }
 0x46b   : > { %1550 = vmatprep.subr.mxu0 %v1469_v11  ;;  %v1467_v24 = vmul.f32 %v1967_v6, %v2781_v19  ;;  %v1969_v55 = vpop.eup %1968  ;;  %v1466_v35 = vmul.f32 %v1967_v6, %v2764_v22  ;;  %v586_v19 = vpop.f32.mrf.mxu0  ;;  %v579_v22 = vadd.f32 %v578_v14, %v499_v61 }
 0x46c   : > { %v1465_v46 = vmul.f32 %v1969_v55, %v2771_v45  ;;  %v1464_v10 = vmul.f32 %v1969_v55, %v2766_v49  ;;  %v587_v4 = vadd.f32 %v586_v19, %v504_v39  ;;  %v585_v45 = vadd.f32 %v584_v3, %v504_v39 }
 0x46d   : > { %v1572_v49 = vstv %s1571_s24 }
 0x46e   : > { %1551 = vmatpush2.xpose.msra.mxu0 %v1468_v20  ;;  %v1971_v18 = vpop.eup %1970 }
 0x46f   : > { %1552 = vmatprep.subr.mxu0 %v1467_v24  ;;  %v1463_v31 = vmul.f32 %v1971_v18, %v2791_v1  ;;  %v1462_v57 = vmul.f32 %v1971_v18, %v2786_v40 }
 0x472   : > { %1553 = vmatpush2.xpose.msra.mxu0 %v1466_v35 }
 0x473   : > { %1554 = vmatprep.subr.mxu0 %v1465_v46 }
 0x476   : > { %1555 = vmatpush2.xpose.msra.mxu0 %v1464_v10 }
 0x477   : > { %1556 = vmatprep.subr.mxu0 %v1463_v31 }
 0x47a   : > { %1557 = vmatpush2.xpose.msra.mxu0 %v1462_v57 }
 0x47d   : > { %1559 = vmatmul.mubr.f32.vlgmr.msra.gmra.mxu0 %v579_v22 }
 0x47e   : > { %1564 = vmatprep.mubr.f32.mxu0 %v587_v4 }
 0x481   : > { %1565 = vmatmul.mubr.f32.gmra.mxu0 %v585_v45 }
 0x53d   : > { %v1560_v1 = vpop.f32.mrf.mxu0 }
 0x53e   : > { %v1573_v51 = vmul.f32 %v1572_v49, %v1560_v1 }
 0x53f   : > { %v1562_v37 = vpop.f32.mrf.mxu0 }
 0x540   : > { %v1577_v40 = vadd.f32 %v1972_v41, %v1573_v51  ;;  %v1574_v8 = vmul.f32 %v1572_v49, %v1562_v37 }
 0x541   : > { %v1566_v36 = vpop.f32.mrf.mxu0 }
 0x542   : > { %1581 = vst [vmem:[%s324_s26] sm:$0xff] %v1577_v40  ;;  %v1578_v34 = vadd.f32 %v1973_v27, %v1574_v8  ;;  %v1575_v59 = vmul.f32 %v1572_v49, %v1566_v36 }
 0x543   : > { %v1568_v52 = vpop.f32.mrf.mxu0 }
 0x544   : > { %1582 = vst [vmem:[%s324_s26 + $0x8] sm:$0xff] %v1578_v34  ;;  %v1579_v32 = vadd.f32 %v1974_v28, %v1575_v59  ;;  %v1576_v43 = vmul.f32 %v1572_v49, %v1568_v52 }
 0x546   : > { %1583 = vst [vmem:[%s324_s26 + $0x10] sm:$0xff] %v1579_v32  ;;  %v1580_v2 = vadd.f32 %v1975_v25, %v1576_v43 }
 0x548   : > { %1584 = vst [vmem:[%s324_s26 + $0x18] sm:$0xff] %v1580_v2 }
 0x549   : > { %2017 = shalt.err (!%p2014_p10)
}
 0x54a   : > { %s2018_s20 = scalar_lea.hbm %s2862_s23, 512  ;;  %s2022_s26 = scalar_lea.hbm %s2914_s8, 1024 }
 0x54b   : > { %p2019_p0 = scmp.ne.s32.totalorder %s2862_s23, %s2018_s20  ;;  %p2023_p1 = scmp.lt.s32.totalorder %s2862_s23, %s2914_s8 }
 0x54c   : > { %p2024_p3 = scmp.lt.s32.totalorder %s2022_s26, %s2018_s20 }
 0x54d   : > { %p2020_p2 = pnand %p2019_p0, %p3009_p12 }
 0x54e   : > { %p2025_p6 = por %p2024_p3, %p2023_p1 }
 0x54f   : > { %p2021_p9 = pneg %p2020_p2 }
 0x551   : > { %p2026_p11 = pnand %p2025_p6, %p2021_p9 }
 0x553   : > { %2029 = shalt.err (!%p2026_p11)
}
 0x554   : > { %s2076_s21 = smov 256   ;;  %s2077_s17 = smov 16  }
 0x555   : > { %1728 = dma.vmem_to_hbm [thread:$0]  (%p3009_p12), %s2856_s14, 512, %s2862_s23, %s1586_s0, %s2076_s21, %s2076_s21, %s2077_s17  }
 0x556 PF: > { %s1614_s25 = sand.u32 1, %s2056_s29   ;;  %p3010_p13 = scmp.ne.s32.totalorder %s2949_s19, 0 }
 0x557   : > { %p3011_p4 = scmp.ge.s32.totalorder %s2068_s10, 2  ;;  %s1615_s27 = scalar_lea.sflag [#allocation5], %s1614_s25 }
 0x559   : > { %p1735_p5 = pnand %p3011_p4, %p3010_p13 }
 0x55b   : > { %p1736_p7 = pneg %p1735_p5 }
 0x55d   : > { %2051 = dma.done.wait (%p1736_p7), %s1615_s27, 512  }
 0x55e   : > { %2053 = vsyncadd (%p1736_p7), %s1615_s27, 4294966784  ;;  %p22_p8 = scmp.ge.s32.totalorder %s2151_s12, 4   ;;  %s3012_s29 = smov %s2060_s30 }
 0x55f   : > { %s3013_s30 = smov %s2064_s9  ;;  %s3014_s9 = smov %s2163_s15 }
 0x560   : > { %s3015_s10 = smov %s2151_s12  ;;  %24 = sbr.rel (!%p22_p8) target bundleno = 7 (0x7), region = 97 }
 0x565   :  { %1620 = vsyncpa [#allocation4], 1 }
 0x566   :  { %1622 = vsyncpa [#allocation4 + $0x1], 1 }
 0x567   :  { %1623 = vsyncpa [#allocation5], 1 }
 0x568   :  { %1625 = vsyncpa [#allocation5 + $0x1], 1 }

</bundles_post_ra>
